<compile_context>
chip_gen: v7x
topology: tpu7x:2x2x1
jax: 0.10.0
libtpu: 0.0.40
codegen_flags: <defaults>
</compile_context>

<pallas_src>
import functools

import jax
import jax.numpy as jnp
from jax import lax
from jax.experimental import pallas as pl
from jax.experimental.pallas import tpu as pltpu


LANES = 128


# ----------------------------------------------------------------------------
# In-kernel helper: exact k-th largest value per batch row via radix bisection
# ----------------------------------------------------------------------------
def _radix_select_kth_largest(vals, k, nbits):
    """Per-row k-th largest element of `vals` (integer bisection, exact counts).

    vals : (TB, PB, 128) non-negative int32, values < 2**nbits
    k    : (TB, 1, 1) float32, integer-valued; k <= 0 returns 2**nbits - 1
    Returns (TB, 1, 1) int32 threshold thr = max{t : count(vals >= t) >= k}.
    """
    thr = jnp.zeros(k.shape, jnp.int32)
    for b in range(nbits - 1, -1, -1):          # static, unrolled
        trial = thr | jnp.int32(1 << b)
        cnt = jnp.sum(jnp.where(vals >= trial, 1.0, 0.0),
                      axis=(-2, -1), keepdims=True)
        thr = jnp.where(cnt >= k, trial, thr)
    return thr


# ----------------------------------------------------------------------------
# Pallas kernel: loss for a TB-sized chunk of the batch (one grid step)
# ----------------------------------------------------------------------------
def _multibox_loss_kernel(loc_p_ref, loc_t_ref, conf_ref, gt_ref, out_ref,
                          *, neg_pos, num_priors, sel_bits):
    # Dense prior layout (priors split over sublanes x lanes):
    #   loc_p_ref, loc_t_ref : (TB, 4, PB, 128)  bf16/f32
    #   conf_ref             : (TB, C, PB, 128)  bf16/f32
    #   gt_ref               : (TB, PB, 128)     i32
    #   out_ref              : (1, 8, 128) f32; sublane 0/1/2 = loss_l/loss_c/num_pos
    gt = gt_ref[...]
    conf = conf_ref[...]
    TB, C, PB, L = conf.shape

    # prior index / padding-validity mask in the dense layout
    sub = lax.broadcasted_iota(jnp.int32, (1, PB, L), 1)
    lane = lax.broadcasted_iota(jnp.int32, (1, PB, L), 2)
    pidx = sub * L + lane                                         # (1,PB,128)
    valid = pidx < num_priors                                     # (1,PB,128)

    pos = gt > 0                                                  # (TB,PB,128)
    num_pos_row = jnp.sum(pos.astype(jnp.float32),
                          axis=(-2, -1), keepdims=True)           # (TB,1,1)

    # --- per-prior cross entropy; class reduction is elementwise slab math ---
    m = conf[:, 0].astype(jnp.float32)
    for c in range(1, C):                                         # static unroll
        m = jnp.maximum(m, conf[:, c].astype(jnp.float32))
    s = jnp.zeros_like(m)
    gt_logit = jnp.zeros_like(m)
    for c in range(C):                                            # static unroll
        xc = conf[:, c].astype(jnp.float32)
        s = s + jnp.exp(xc - m)
        gt_logit = gt_logit + jnp.where(gt == c, xc, 0.0)
    ce = m + jnp.log(s) - gt_logit                                # (TB,PB,128)

    # --- hard negative mining: top-num_neg of the positive-zeroed CE ---------
    # Positives and padded priors are excluded.  CE >= 0 so its int32 bit
    # pattern preserves ordering; the second where scrubs -0.0 / NaN so the
    # bitcast ordering trick stays sound.
    mining = jnp.where(pos | jnp.logical_not(valid), 0.0, ce)
    mining = jnp.where(mining > 0.0, mining, 0.0)
    bits = pltpu.bitcast(mining, jnp.int32) >> (31 - sel_bits)    # [0, 2**sel_bits)

    num_neg = jnp.minimum(jnp.float32(neg_pos) * num_pos_row,
                          jnp.float32(num_priors - 1))            # (TB,1,1)

    thr_v = _radix_select_kth_largest(bits, num_neg, sel_bits)    # (TB,1,1)
    gt_mask = bits > thr_v
    tied = bits == thr_v
    n_gt = jnp.sum(jnp.where(gt_mask, 1.0, 0.0), axis=(-2, -1), keepdims=True)
    n_tied_needed = num_neg - n_gt

    # among tied (valid) elements keep exactly n_tied_needed lowest-index ones;
    # padded priors get rkey == 0 and can never be selected.
    rkey = jnp.where(tied & valid, jnp.int32(PB * L) - pidx, 0)
    nbits_idx = int(PB * L + 1).bit_length()
    thr_i = _radix_select_kth_largest(rkey, n_tied_needed, nbits_idx)
    neg = gt_mask | (tied & valid & (rkey >= thr_i))

    sel = (pos | neg) & valid
    loss_c = jnp.sum(jnp.where(sel, ce, 0.0))

    # --- smooth L1 on positive priors (dense (TB,4,PB,128)) ------------------
    d = loc_p_ref[...].astype(jnp.float32) - loc_t_ref[...].astype(jnp.float32)
    ad = jnp.abs(d)
    sl1 = jnp.where(ad < 1.0, 0.5 * ad * ad, ad - 0.5)            # (TB,4,PB,128)
    loss_l = jnp.sum(jnp.where(pos[:, None, :, :], sl1, 0.0))

    num_pos_total = jnp.sum(num_pos_row)

    # single lane-dense output block
    row = lax.broadcasted_iota(jnp.int32, out_ref.shape, 1)
    out_ref[...] = jnp.where(
        row == 0, loss_l,
        jnp.where(row == 1, loss_c,
                  jnp.where(row == 2, num_pos_total, 0.0)))


# ----------------------------------------------------------------------------
# Plain-JAX glue: SSD ground-truth matching (jaccard / encode / index_fill)
# ----------------------------------------------------------------------------
def _point_form(boxes):
    return jnp.concatenate([boxes[:, :2] - boxes[:, 2:] / 2,
                            boxes[:, :2] + boxes[:, 2:] / 2], axis=1)


def _intersect(box_a, box_b):
    max_xy = jnp.minimum(box_a[:, None, 2:], box_b[None, :, 2:])
    min_xy = jnp.maximum(box_a[:, None, :2], box_b[None, :, :2])
    inter = jnp.clip(max_xy - min_xy, 0.0, None)
    return inter[..., 0] * inter[..., 1]


def _jaccard(box_a, box_b):
    inter = _intersect(box_a, box_b)
    area_a = ((box_a[:, 2] - box_a[:, 0]) * (box_a[:, 3] - box_a[:, 1]))[:, None]
    area_b = ((box_b[:, 2] - box_b[:, 0]) * (box_b[:, 3] - box_b[:, 1]))[None, :]
    return inter / (area_a + area_b - inter)


def _encode(matched, priors, variances):
    g_cxcy = (matched[:, :2] + matched[:, 2:]) / 2 - priors[:, :2]
    g_cxcy = g_cxcy / (variances[0] * priors[:, 2:])
    g_wh = (matched[:, 2:] - matched[:, :2]) / priors[:, 2:]
    g_wh = jnp.log(g_wh) / variances[1]
    return jnp.concatenate([g_cxcy, g_wh], axis=1)


def _match_single(threshold, truths, priors, variances, labels):
    # TODO(synk): data-dependent scatter (index_fill + per-truth override loop)
    # has no clean Pallas equivalent; kept in plain JAX.
    overlaps = _jaccard(truths, _point_form(priors))          # (n, P)
    best_prior_idx = jnp.argmax(overlaps, axis=1)              # (n,)
    best_truth_overlap = jnp.max(overlaps, axis=0)             # (P,)
    best_truth_idx = jnp.argmax(overlaps, axis=0)              # (P,)
    best_truth_overlap = best_truth_overlap.at[best_prior_idx].set(2.0)
    n = truths.shape[0]
    for j in range(n):   # mirrors the PyTorch loop (later j wins on duplicates)
        best_truth_idx = best_truth_idx.at[best_prior_idx[j]].set(j)
    matches = truths[best_truth_idx]                           # (P, 4)
    conf = labels[best_truth_idx].astype(jnp.int32) + 1        # (P,)
    conf = jnp.where(best_truth_overlap < threshold, 0, conf)
    loc = _encode(matches, priors, variances)                  # (P, 4)
    return loc, conf


# ----------------------------------------------------------------------------
# Wrapper: MultiBoxLoss.forward
# ----------------------------------------------------------------------------
def multibox_loss(loc_data, conf_data, priors, targets,
                  num_classes=21, overlap_thresh=0.5, neg_pos=3,
                  batch_block=8, select_bits=20, input_dtype=jnp.bfloat16):
    B, P, _ = loc_data.shape
    C = conf_data.shape[-1]
    assert C == num_classes
    variances = (0.1, 0.2)

    priors = priors[:P, :]
    truths = targets[..., :4]
    labels = targets[..., 4]

    loc_t, conf_t = jax.vmap(
        lambda t, l: _match_single(overlap_thresh, t, priors, variances, l)
    )(truths, labels)                                          # (B,P,4), (B,P)

    # dense prior layout: pad P to a multiple of 128, split over sublanes/lanes
    PB = -(-P // LANES)
    P_pad = PB * LANES

    def to_dense(x_bpk, dtype):        # (B, P, K) -> (B, K, PB, 128)
        x = jnp.transpose(x_bpk, (0, 2, 1))
        if P_pad != P:
            x = jnp.pad(x, ((0, 0), (0, 0), (0, P_pad - P)))
        return x.reshape(B, x.shape[1], PB, LANES).astype(dtype)

    loc_p_d = to_dense(loc_data, input_dtype)                  # (B,4,PB,128)
    loc_t_d = to_dense(loc_t, input_dtype)                     # (B,4,PB,128)
    conf_d = to_dense(conf_data, input_dtype)                  # (B,C,PB,128)

    gt = conf_t.astype(jnp.int32)
    if P_pad != P:
        gt = jnp.pad(gt, ((0, 0), (0, P_pad - P)))             # pad class = 0
    gt = gt.reshape(B, PB, LANES)                              # (B,PB,128)

    # batch chunking: keep >= 2 grid steps when B > 1 (both v7x TensorCores),
    # TB capped at batch_block (<= 8 keeps VMEM within v7x's 64 MiB budget).
    TB = min(batch_block, B)
    if B > 1:
        TB = min(TB, -(-B // 2))
    G = -(-B // TB)
    Bpad = G * TB
    if Bpad != B:
        pad4 = ((0, Bpad - B), (0, 0), (0, 0), (0, 0))
        loc_p_d = jnp.pad(loc_p_d, pad4)
        loc_t_d = jnp.pad(loc_t_d, pad4)
        conf_d = jnp.pad(conf_d, pad4)
        gt = jnp.pad(gt, ((0, Bpad - B), (0, 0), (0, 0)))      # padded rows: gt == 0

    sel_bits = max(1, min(31, int(select_bits)))
    kernel = functools.partial(_multibox_loss_kernel, neg_pos=neg_pos,
                               num_priors=P, sel_bits=sel_bits)

    out = pl.pallas_call(
        kernel,
        out_shape=jax.ShapeDtypeStruct((G, 8, 128), jnp.float32),
        grid=(G,),
        in_specs=[
            pl.BlockSpec((TB, 4, PB, LANES), lambda g: (g, 0, 0, 0)),
            pl.BlockSpec((TB, 4, PB, LANES), lambda g: (g, 0, 0, 0)),
            pl.BlockSpec((TB, C, PB, LANES), lambda g: (g, 0, 0, 0)),
            pl.BlockSpec((TB, PB, LANES), lambda g: (g, 0, 0)),
        ],
        out_specs=pl.BlockSpec((1, 8, 128), lambda g: (g, 0, 0)),
        compiler_params=pltpu.CompilerParams(
            dimension_semantics=("parallel",),
            vmem_limit_bytes=48 * 1024 * 1024),
    )(loc_p_d, loc_t_d, conf_d, gt)

    loss_l_sum = jnp.sum(out[:, 0, 0])
    loss_c_sum = jnp.sum(out[:, 1, 0])
    N = jnp.sum(out[:, 2, 0])
    # NOTE: diverges from PyTorch here, which yields inf/NaN when no positives.
    N = jnp.maximum(N, 1.0)
    return loss_l_sum / N, loss_c_sum / N


# ----------------------------------------------------------------------------
if __name__ == "__main__":
    B, P, C, NOBJ = 2, 200, 21, 3   # P not a multiple of 128 -> exercises padding

    key = jax.random.PRNGKey(0)
    k1, k2, k3, k4, k5, k6, k7 = jax.random.split(key, 7)

    loc_data = jax.random.normal(k1, (B, P, 4), jnp.float32)
    conf_data = jax.random.normal(k2, (B, P, C), jnp.float32)

    # priors in center-size form
    p_cxcy = jax.random.uniform(k3, (P, 2), minval=0.1, maxval=0.9)
    p_wh = jax.random.uniform(k4, (P, 2), minval=0.1, maxval=0.4)
    priors = jnp.concatenate([p_cxcy, p_wh], axis=1).astype(jnp.float32)

    # targets: point-form GT boxes + class label in the last column
    t_cxcy = jax.random.uniform(k5, (B, NOBJ, 2), minval=0.25, maxval=0.75)
    t_wh = jax.random.uniform(k6, (B, NOBJ, 2), minval=0.1, maxval=0.3)
    t_min = t_cxcy - t_wh / 2
    t_max = t_cxcy + t_wh / 2
    labels = jax.random.randint(k7, (B, NOBJ), 0, C - 1).astype(jnp.float32)
    targets = jnp.concatenate([t_min, t_max, labels[..., None]], axis=-1)

    loss_l, loss_c = multibox_loss(loc_data, conf_data, priors, targets,
                                   num_classes=C, overlap_thresh=0.5, neg_pos=3)
    jax.block_until_ready((loss_l, loss_c))
    assert bool(jnp.isfinite(loss_l)) and bool(jnp.isfinite(loss_c))
    print("KERNEL_OK")
</pallas_src>

<mosaic_0001>
module attributes {stable_mosaic.version = 11 : i64} {
  func.func @_multibox_loss_kernel(%arg0: i32, %arg1: memref<1x4x2x128xbf16, #tpu.memory_space<vmem>>, %arg2: memref<1x4x2x128xbf16, #tpu.memory_space<vmem>>, %arg3: memref<1x21x2x128xbf16, #tpu.memory_space<vmem>>, %arg4: memref<1x2x128xi32, #tpu.memory_space<vmem>>, %arg5: memref<1x8x128xf32, #tpu.memory_space<vmem>>) attributes {dimension_semantics = [#tpu.dimension_semantics<parallel>], iteration_bounds = array<i64: 2>, scalar_prefetch = 0 : i64, scratch_operands = 0 : i64, tpu.core_type = #tpu.core_type<tc>, window_params = [{transform_indices = @transform_0, window_bounds = array<i64: 1, 4, 2, 128>}, {transform_indices = @transform_1, window_bounds = array<i64: 1, 4, 2, 128>}, {transform_indices = @transform_2, window_bounds = array<i64: 1, 21, 2, 128>}, {transform_indices = @transform_3, window_bounds = array<i64: 1, 2, 128>}, {transform_indices = @transform_4, window_bounds = array<i64: 1, 8, 128>}]} {
    %c0 = arith.constant 0 : index
    %c0_0 = arith.constant 0 : index
    %c0_1 = arith.constant 0 : index
    %0 = vector.load %arg4[%c0, %c0_0, %c0_1] : memref<1x2x128xi32, #tpu.memory_space<vmem>>, vector<1x2x128xi32>
    %c0_2 = arith.constant 0 : index
    %c0_3 = arith.constant 0 : index
    %c0_4 = arith.constant 0 : index
    %c0_5 = arith.constant 0 : index
    %1 = vector.load %arg3[%c0_2, %c0_3, %c0_4, %c0_5] : memref<1x21x2x128xbf16, #tpu.memory_space<vmem>>, vector<1x21x2x128xbf16>
    %2 = tpu.iota {dimensions = array<i32: 1>} : vector<1x2x128xi32>
    %3 = tpu.iota {dimensions = array<i32: 2>} : vector<1x2x128xi32>
    %c128_i32 = arith.constant 128 : i32
    %4 = vector.broadcast %c128_i32 : i32 to vector<1x2x128xi32>
    %5 = arith.muli %2, %4 : vector<1x2x128xi32>
    %6 = arith.addi %5, %3 : vector<1x2x128xi32>
    %c200_i32 = arith.constant 200 : i32
    %7 = vector.broadcast %c200_i32 : i32 to vector<1x2x128xi32>
    %8 = arith.cmpi slt, %6, %7 : vector<1x2x128xi32>
    %c0_i32 = arith.constant 0 : i32
    %9 = vector.broadcast %c0_i32 : i32 to vector<1x2x128xi32>
    %10 = arith.cmpi sgt, %0, %9 : vector<1x2x128xi32>
    %11 = arith.extui %10 : vector<1x2x128xi1> to vector<1x2x128xi32>
    %12 = arith.sitofp %11 : vector<1x2x128xi32> to vector<1x2x128xf32>
    %cst = arith.constant dense<0.000000e+00> : vector<1xf32>
    %13 = vector.multi_reduction <add>, %12, %cst [1, 2] : vector<1x2x128xf32> to vector<1xf32>
    %14 = vector.shape_cast %13 : vector<1xf32> to vector<1x1x1xf32>
    %15 = vector.extract_strided_slice %1 {offsets = [0, 0, 0, 0], sizes = [1, 1, 2, 128], strides = [1, 1, 1, 1]} : vector<1x21x2x128xbf16> to vector<1x1x2x128xbf16>
    %16 = vector.shape_cast %15 : vector<1x1x2x128xbf16> to vector<1x2x128xbf16>
    %17 = arith.extf %16 : vector<1x2x128xbf16> to vector<1x2x128xf32>
    %18 = vector.extract_strided_slice %1 {offsets = [0, 1, 0, 0], sizes = [1, 1, 2, 128], strides = [1, 1, 1, 1]} : vector<1x21x2x128xbf16> to vector<1x1x2x128xbf16>
    %19 = vector.shape_cast %18 : vector<1x1x2x128xbf16> to vector<1x2x128xbf16>
    %20 = arith.extf %19 : vector<1x2x128xbf16> to vector<1x2x128xf32>
    %21 = arith.maximumf %17, %20 : vector<1x2x128xf32>
    %22 = vector.extract_strided_slice %1 {offsets = [0, 2, 0, 0], sizes = [1, 1, 2, 128], strides = [1, 1, 1, 1]} : vector<1x21x2x128xbf16> to vector<1x1x2x128xbf16>
    %23 = vector.shape_cast %22 : vector<1x1x2x128xbf16> to vector<1x2x128xbf16>
    %24 = arith.extf %23 : vector<1x2x128xbf16> to vector<1x2x128xf32>
    %25 = arith.maximumf %21, %24 : vector<1x2x128xf32>
    %26 = vector.extract_strided_slice %1 {offsets = [0, 3, 0, 0], sizes = [1, 1, 2, 128], strides = [1, 1, 1, 1]} : vector<1x21x2x128xbf16> to vector<1x1x2x128xbf16>
    %27 = vector.shape_cast %26 : vector<1x1x2x128xbf16> to vector<1x2x128xbf16>
    %28 = arith.extf %27 : vector<1x2x128xbf16> to vector<1x2x128xf32>
    %29 = arith.maximumf %25, %28 : vector<1x2x128xf32>
    %30 = vector.extract_strided_slice %1 {offsets = [0, 4, 0, 0], sizes = [1, 1, 2, 128], strides = [1, 1, 1, 1]} : vector<1x21x2x128xbf16> to vector<1x1x2x128xbf16>
    %31 = vector.shape_cast %30 : vector<1x1x2x128xbf16> to vector<1x2x128xbf16>
    %32 = arith.extf %31 : vector<1x2x128xbf16> to vector<1x2x128xf32>
    %33 = arith.maximumf %29, %32 : vector<1x2x128xf32>
    %34 = vector.extract_strided_slice %1 {offsets = [0, 5, 0, 0], sizes = [1, 1, 2, 128], strides = [1, 1, 1, 1]} : vector<1x21x2x128xbf16> to vector<1x1x2x128xbf16>
    %35 = vector.shape_cast %34 : vector<1x1x2x128xbf16> to vector<1x2x128xbf16>
    %36 = arith.extf %35 : vector<1x2x128xbf16> to vector<1x2x128xf32>
    %37 = arith.maximumf %33, %36 : vector<1x2x128xf32>
    %38 = vector.extract_strided_slice %1 {offsets = [0, 6, 0, 0], sizes = [1, 1, 2, 128], strides = [1, 1, 1, 1]} : vector<1x21x2x128xbf16> to vector<1x1x2x128xbf16>
    %39 = vector.shape_cast %38 : vector<1x1x2x128xbf16> to vector<1x2x128xbf16>
    %40 = arith.extf %39 : vector<1x2x128xbf16> to vector<1x2x128xf32>
    %41 = arith.maximumf %37, %40 : vector<1x2x128xf32>
    %42 = vector.extract_strided_slice %1 {offsets = [0, 7, 0, 0], sizes = [1, 1, 2, 128], strides = [1, 1, 1, 1]} : vector<1x21x2x128xbf16> to vector<1x1x2x128xbf16>
    %43 = vector.shape_cast %42 : vector<1x1x2x128xbf16> to vector<1x2x128xbf16>
    %44 = arith.extf %43 : vector<1x2x128xbf16> to vector<1x2x128xf32>
    %45 = arith.maximumf %41, %44 : vector<1x2x128xf32>
    %46 = vector.extract_strided_slice %1 {offsets = [0, 8, 0, 0], sizes = [1, 1, 2, 128], strides = [1, 1, 1, 1]} : vector<1x21x2x128xbf16> to vector<1x1x2x128xbf16>
    %47 = vector.shape_cast %46 : vector<1x1x2x128xbf16> to vector<1x2x128xbf16>
    %48 = arith.extf %47 : vector<1x2x128xbf16> to vector<1x2x128xf32>
    %49 = arith.maximumf %45, %48 : vector<1x2x128xf32>
    %50 = vector.extract_strided_slice %1 {offsets = [0, 9, 0, 0], sizes = [1, 1, 2, 128], strides = [1, 1, 1, 1]} : vector<1x21x2x128xbf16> to vector<1x1x2x128xbf16>
    %51 = vector.shape_cast %50 : vector<1x1x2x128xbf16> to vector<1x2x128xbf16>
    %52 = arith.extf %51 : vector<1x2x128xbf16> to vector<1x2x128xf32>
    %53 = arith.maximumf %49, %52 : vector<1x2x128xf32>
    %54 = vector.extract_strided_slice %1 {offsets = [0, 10, 0, 0], sizes = [1, 1, 2, 128], strides = [1, 1, 1, 1]} : vector<1x21x2x128xbf16> to vector<1x1x2x128xbf16>
    %55 = vector.shape_cast %54 : vector<1x1x2x128xbf16> to vector<1x2x128xbf16>
    %56 = arith.extf %55 : vector<1x2x128xbf16> to vector<1x2x128xf32>
    %57 = arith.maximumf %53, %56 : vector<1x2x128xf32>
    %58 = vector.extract_strided_slice %1 {offsets = [0, 11, 0, 0], sizes = [1, 1, 2, 128], strides = [1, 1, 1, 1]} : vector<1x21x2x128xbf16> to vector<1x1x2x128xbf16>
    %59 = vector.shape_cast %58 : vector<1x1x2x128xbf16> to vector<1x2x128xbf16>
    %60 = arith.extf %59 : vector<1x2x128xbf16> to vector<1x2x128xf32>
    %61 = arith.maximumf %57, %60 : vector<1x2x128xf32>
    %62 = vector.extract_strided_slice %1 {offsets = [0, 12, 0, 0], sizes = [1, 1, 2, 128], strides = [1, 1, 1, 1]} : vector<1x21x2x128xbf16> to vector<1x1x2x128xbf16>
    %63 = vector.shape_cast %62 : vector<1x1x2x128xbf16> to vector<1x2x128xbf16>
    %64 = arith.extf %63 : vector<1x2x128xbf16> to vector<1x2x128xf32>
    %65 = arith.maximumf %61, %64 : vector<1x2x128xf32>
    %66 = vector.extract_strided_slice %1 {offsets = [0, 13, 0, 0], sizes = [1, 1, 2, 128], strides = [1, 1, 1, 1]} : vector<1x21x2x128xbf16> to vector<1x1x2x128xbf16>
    %67 = vector.shape_cast %66 : vector<1x1x2x128xbf16> to vector<1x2x128xbf16>
    %68 = arith.extf %67 : vector<1x2x128xbf16> to vector<1x2x128xf32>
    %69 = arith.maximumf %65, %68 : vector<1x2x128xf32>
    %70 = vector.extract_strided_slice %1 {offsets = [0, 14, 0, 0], sizes = [1, 1, 2, 128], strides = [1, 1, 1, 1]} : vector<1x21x2x128xbf16> to vector<1x1x2x128xbf16>
    %71 = vector.shape_cast %70 : vector<1x1x2x128xbf16> to vector<1x2x128xbf16>
    %72 = arith.extf %71 : vector<1x2x128xbf16> to vector<1x2x128xf32>
    %73 = arith.maximumf %69, %72 : vector<1x2x128xf32>
    %74 = vector.extract_strided_slice %1 {offsets = [0, 15, 0, 0], sizes = [1, 1, 2, 128], strides = [1, 1, 1, 1]} : vector<1x21x2x128xbf16> to vector<1x1x2x128xbf16>
    %75 = vector.shape_cast %74 : vector<1x1x2x128xbf16> to vector<1x2x128xbf16>
    %76 = arith.extf %75 : vector<1x2x128xbf16> to vector<1x2x128xf32>
    %77 = arith.maximumf %73, %76 : vector<1x2x128xf32>
    %78 = vector.extract_strided_slice %1 {offsets = [0, 16, 0, 0], sizes = [1, 1, 2, 128], strides = [1, 1, 1, 1]} : vector<1x21x2x128xbf16> to vector<1x1x2x128xbf16>
    %79 = vector.shape_cast %78 : vector<1x1x2x128xbf16> to vector<1x2x128xbf16>
    %80 = arith.extf %79 : vector<1x2x128xbf16> to vector<1x2x128xf32>
    %81 = arith.maximumf %77, %80 : vector<1x2x128xf32>
    %82 = vector.extract_strided_slice %1 {offsets = [0, 17, 0, 0], sizes = [1, 1, 2, 128], strides = [1, 1, 1, 1]} : vector<1x21x2x128xbf16> to vector<1x1x2x128xbf16>
    %83 = vector.shape_cast %82 : vector<1x1x2x128xbf16> to vector<1x2x128xbf16>
    %84 = arith.extf %83 : vector<1x2x128xbf16> to vector<1x2x128xf32>
    %85 = arith.maximumf %81, %84 : vector<1x2x128xf32>
    %86 = vector.extract_strided_slice %1 {offsets = [0, 18, 0, 0], sizes = [1, 1, 2, 128], strides = [1, 1, 1, 1]} : vector<1x21x2x128xbf16> to vector<1x1x2x128xbf16>
    %87 = vector.shape_cast %86 : vector<1x1x2x128xbf16> to vector<1x2x128xbf16>
    %88 = arith.extf %87 : vector<1x2x128xbf16> to vector<1x2x128xf32>
    %89 = arith.maximumf %85, %88 : vector<1x2x128xf32>
    %90 = vector.extract_strided_slice %1 {offsets = [0, 19, 0, 0], sizes = [1, 1, 2, 128], strides = [1, 1, 1, 1]} : vector<1x21x2x128xbf16> to vector<1x1x2x128xbf16>
    %91 = vector.shape_cast %90 : vector<1x1x2x128xbf16> to vector<1x2x128xbf16>
    %92 = arith.extf %91 : vector<1x2x128xbf16> to vector<1x2x128xf32>
    %93 = arith.maximumf %89, %92 : vector<1x2x128xf32>
    %94 = vector.extract_strided_slice %1 {offsets = [0, 20, 0, 0], sizes = [1, 1, 2, 128], strides = [1, 1, 1, 1]} : vector<1x21x2x128xbf16> to vector<1x1x2x128xbf16>
    %95 = vector.shape_cast %94 : vector<1x1x2x128xbf16> to vector<1x2x128xbf16>
    %96 = arith.extf %95 : vector<1x2x128xbf16> to vector<1x2x128xf32>
    %97 = arith.maximumf %93, %96 : vector<1x2x128xf32>
    %cst_6 = arith.constant 0.000000e+00 : f32
    %98 = vector.broadcast %cst_6 : f32 to vector<1x2x128xf32>
    %cst_7 = arith.constant 0.000000e+00 : f32
    %99 = vector.broadcast %cst_7 : f32 to vector<1x2x128xf32>
    %100 = vector.extract_strided_slice %1 {offsets = [0, 0, 0, 0], sizes = [1, 1, 2, 128], strides = [1, 1, 1, 1]} : vector<1x21x2x128xbf16> to vector<1x1x2x128xbf16>
    %101 = vector.shape_cast %100 : vector<1x1x2x128xbf16> to vector<1x2x128xbf16>
    %102 = arith.extf %101 : vector<1x2x128xbf16> to vector<1x2x128xf32>
    %103 = arith.subf %102, %97 : vector<1x2x128xf32>
    %104 = math.exp %103 : vector<1x2x128xf32>
    %105 = arith.addf %98, %104 : vector<1x2x128xf32>
    %c0_i32_8 = arith.constant 0 : i32
    %106 = vector.broadcast %c0_i32_8 : i32 to vector<1x2x128xi32>
    %107 = arith.cmpi eq, %0, %106 : vector<1x2x128xi32>
    %cst_9 = arith.constant 0.000000e+00 : f32
    %108 = vector.broadcast %cst_9 : f32 to vector<1x2x128xf32>
    %109 = arith.select %107, %102, %108 : vector<1x2x128xi1>, vector<1x2x128xf32>
    %110 = arith.addf %99, %109 : vector<1x2x128xf32>
    %111 = vector.extract_strided_slice %1 {offsets = [0, 1, 0, 0], sizes = [1, 1, 2, 128], strides = [1, 1, 1, 1]} : vector<1x21x2x128xbf16> to vector<1x1x2x128xbf16>
    %112 = vector.shape_cast %111 : vector<1x1x2x128xbf16> to vector<1x2x128xbf16>
    %113 = arith.extf %112 : vector<1x2x128xbf16> to vector<1x2x128xf32>
    %114 = arith.subf %113, %97 : vector<1x2x128xf32>
    %115 = math.exp %114 : vector<1x2x128xf32>
    %116 = arith.addf %105, %115 : vector<1x2x128xf32>
    %c1_i32 = arith.constant 1 : i32
    %117 = vector.broadcast %c1_i32 : i32 to vector<1x2x128xi32>
    %118 = arith.cmpi eq, %0, %117 : vector<1x2x128xi32>
    %cst_10 = arith.constant 0.000000e+00 : f32
    %119 = vector.broadcast %cst_10 : f32 to vector<1x2x128xf32>
    %120 = arith.select %118, %113, %119 : vector<1x2x128xi1>, vector<1x2x128xf32>
    %121 = arith.addf %110, %120 : vector<1x2x128xf32>
    %122 = vector.extract_strided_slice %1 {offsets = [0, 2, 0, 0], sizes = [1, 1, 2, 128], strides = [1, 1, 1, 1]} : vector<1x21x2x128xbf16> to vector<1x1x2x128xbf16>
    %123 = vector.shape_cast %122 : vector<1x1x2x128xbf16> to vector<1x2x128xbf16>
    %124 = arith.extf %123 : vector<1x2x128xbf16> to vector<1x2x128xf32>
    %125 = arith.subf %124, %97 : vector<1x2x128xf32>
    %126 = math.exp %125 : vector<1x2x128xf32>
    %127 = arith.addf %116, %126 : vector<1x2x128xf32>
    %c2_i32 = arith.constant 2 : i32
    %128 = vector.broadcast %c2_i32 : i32 to vector<1x2x128xi32>
    %129 = arith.cmpi eq, %0, %128 : vector<1x2x128xi32>
    %cst_11 = arith.constant 0.000000e+00 : f32
    %130 = vector.broadcast %cst_11 : f32 to vector<1x2x128xf32>
    %131 = arith.select %129, %124, %130 : vector<1x2x128xi1>, vector<1x2x128xf32>
    %132 = arith.addf %121, %131 : vector<1x2x128xf32>
    %133 = vector.extract_strided_slice %1 {offsets = [0, 3, 0, 0], sizes = [1, 1, 2, 128], strides = [1, 1, 1, 1]} : vector<1x21x2x128xbf16> to vector<1x1x2x128xbf16>
    %134 = vector.shape_cast %133 : vector<1x1x2x128xbf16> to vector<1x2x128xbf16>
    %135 = arith.extf %134 : vector<1x2x128xbf16> to vector<1x2x128xf32>
    %136 = arith.subf %135, %97 : vector<1x2x128xf32>
    %137 = math.exp %136 : vector<1x2x128xf32>
    %138 = arith.addf %127, %137 : vector<1x2x128xf32>
    %c3_i32 = arith.constant 3 : i32
    %139 = vector.broadcast %c3_i32 : i32 to vector<1x2x128xi32>
    %140 = arith.cmpi eq, %0, %139 : vector<1x2x128xi32>
    %cst_12 = arith.constant 0.000000e+00 : f32
    %141 = vector.broadcast %cst_12 : f32 to vector<1x2x128xf32>
    %142 = arith.select %140, %135, %141 : vector<1x2x128xi1>, vector<1x2x128xf32>
    %143 = arith.addf %132, %142 : vector<1x2x128xf32>
    %144 = vector.extract_strided_slice %1 {offsets = [0, 4, 0, 0], sizes = [1, 1, 2, 128], strides = [1, 1, 1, 1]} : vector<1x21x2x128xbf16> to vector<1x1x2x128xbf16>
    %145 = vector.shape_cast %144 : vector<1x1x2x128xbf16> to vector<1x2x128xbf16>
    %146 = arith.extf %145 : vector<1x2x128xbf16> to vector<1x2x128xf32>
    %147 = arith.subf %146, %97 : vector<1x2x128xf32>
    %148 = math.exp %147 : vector<1x2x128xf32>
    %149 = arith.addf %138, %148 : vector<1x2x128xf32>
    %c4_i32 = arith.constant 4 : i32
    %150 = vector.broadcast %c4_i32 : i32 to vector<1x2x128xi32>
    %151 = arith.cmpi eq, %0, %150 : vector<1x2x128xi32>
    %cst_13 = arith.constant 0.000000e+00 : f32
    %152 = vector.broadcast %cst_13 : f32 to vector<1x2x128xf32>
    %153 = arith.select %151, %146, %152 : vector<1x2x128xi1>, vector<1x2x128xf32>
    %154 = arith.addf %143, %153 : vector<1x2x128xf32>
    %155 = vector.extract_strided_slice %1 {offsets = [0, 5, 0, 0], sizes = [1, 1, 2, 128], strides = [1, 1, 1, 1]} : vector<1x21x2x128xbf16> to vector<1x1x2x128xbf16>
    %156 = vector.shape_cast %155 : vector<1x1x2x128xbf16> to vector<1x2x128xbf16>
    %157 = arith.extf %156 : vector<1x2x128xbf16> to vector<1x2x128xf32>
    %158 = arith.subf %157, %97 : vector<1x2x128xf32>
    %159 = math.exp %158 : vector<1x2x128xf32>
    %160 = arith.addf %149, %159 : vector<1x2x128xf32>
    %c5_i32 = arith.constant 5 : i32
    %161 = vector.broadcast %c5_i32 : i32 to vector<1x2x128xi32>
    %162 = arith.cmpi eq, %0, %161 : vector<1x2x128xi32>
    %cst_14 = arith.constant 0.000000e+00 : f32
    %163 = vector.broadcast %cst_14 : f32 to vector<1x2x128xf32>
    %164 = arith.select %162, %157, %163 : vector<1x2x128xi1>, vector<1x2x128xf32>
    %165 = arith.addf %154, %164 : vector<1x2x128xf32>
    %166 = vector.extract_strided_slice %1 {offsets = [0, 6, 0, 0], sizes = [1, 1, 2, 128], strides = [1, 1, 1, 1]} : vector<1x21x2x128xbf16> to vector<1x1x2x128xbf16>
    %167 = vector.shape_cast %166 : vector<1x1x2x128xbf16> to vector<1x2x128xbf16>
    %168 = arith.extf %167 : vector<1x2x128xbf16> to vector<1x2x128xf32>
    %169 = arith.subf %168, %97 : vector<1x2x128xf32>
    %170 = math.exp %169 : vector<1x2x128xf32>
    %171 = arith.addf %160, %170 : vector<1x2x128xf32>
    %c6_i32 = arith.constant 6 : i32
    %172 = vector.broadcast %c6_i32 : i32 to vector<1x2x128xi32>
    %173 = arith.cmpi eq, %0, %172 : vector<1x2x128xi32>
    %cst_15 = arith.constant 0.000000e+00 : f32
    %174 = vector.broadcast %cst_15 : f32 to vector<1x2x128xf32>
    %175 = arith.select %173, %168, %174 : vector<1x2x128xi1>, vector<1x2x128xf32>
    %176 = arith.addf %165, %175 : vector<1x2x128xf32>
    %177 = vector.extract_strided_slice %1 {offsets = [0, 7, 0, 0], sizes = [1, 1, 2, 128], strides = [1, 1, 1, 1]} : vector<1x21x2x128xbf16> to vector<1x1x2x128xbf16>
    %178 = vector.shape_cast %177 : vector<1x1x2x128xbf16> to vector<1x2x128xbf16>
    %179 = arith.extf %178 : vector<1x2x128xbf16> to vector<1x2x128xf32>
    %180 = arith.subf %179, %97 : vector<1x2x128xf32>
    %181 = math.exp %180 : vector<1x2x128xf32>
    %182 = arith.addf %171, %181 : vector<1x2x128xf32>
    %c7_i32 = arith.constant 7 : i32
    %183 = vector.broadcast %c7_i32 : i32 to vector<1x2x128xi32>
    %184 = arith.cmpi eq, %0, %183 : vector<1x2x128xi32>
    %cst_16 = arith.constant 0.000000e+00 : f32
    %185 = vector.broadcast %cst_16 : f32 to vector<1x2x128xf32>
    %186 = arith.select %184, %179, %185 : vector<1x2x128xi1>, vector<1x2x128xf32>
    %187 = arith.addf %176, %186 : vector<1x2x128xf32>
    %188 = vector.extract_strided_slice %1 {offsets = [0, 8, 0, 0], sizes = [1, 1, 2, 128], strides = [1, 1, 1, 1]} : vector<1x21x2x128xbf16> to vector<1x1x2x128xbf16>
    %189 = vector.shape_cast %188 : vector<1x1x2x128xbf16> to vector<1x2x128xbf16>
    %190 = arith.extf %189 : vector<1x2x128xbf16> to vector<1x2x128xf32>
    %191 = arith.subf %190, %97 : vector<1x2x128xf32>
    %192 = math.exp %191 : vector<1x2x128xf32>
    %193 = arith.addf %182, %192 : vector<1x2x128xf32>
    %c8_i32 = arith.constant 8 : i32
    %194 = vector.broadcast %c8_i32 : i32 to vector<1x2x128xi32>
    %195 = arith.cmpi eq, %0, %194 : vector<1x2x128xi32>
    %cst_17 = arith.constant 0.000000e+00 : f32
    %196 = vector.broadcast %cst_17 : f32 to vector<1x2x128xf32>
    %197 = arith.select %195, %190, %196 : vector<1x2x128xi1>, vector<1x2x128xf32>
    %198 = arith.addf %187, %197 : vector<1x2x128xf32>
    %199 = vector.extract_strided_slice %1 {offsets = [0, 9, 0, 0], sizes = [1, 1, 2, 128], strides = [1, 1, 1, 1]} : vector<1x21x2x128xbf16> to vector<1x1x2x128xbf16>
    %200 = vector.shape_cast %199 : vector<1x1x2x128xbf16> to vector<1x2x128xbf16>
    %201 = arith.extf %200 : vector<1x2x128xbf16> to vector<1x2x128xf32>
    %202 = arith.subf %201, %97 : vector<1x2x128xf32>
    %203 = math.exp %202 : vector<1x2x128xf32>
    %204 = arith.addf %193, %203 : vector<1x2x128xf32>
    %c9_i32 = arith.constant 9 : i32
    %205 = vector.broadcast %c9_i32 : i32 to vector<1x2x128xi32>
    %206 = arith.cmpi eq, %0, %205 : vector<1x2x128xi32>
    %cst_18 = arith.constant 0.000000e+00 : f32
    %207 = vector.broadcast %cst_18 : f32 to vector<1x2x128xf32>
    %208 = arith.select %206, %201, %207 : vector<1x2x128xi1>, vector<1x2x128xf32>
    %209 = arith.addf %198, %208 : vector<1x2x128xf32>
    %210 = vector.extract_strided_slice %1 {offsets = [0, 10, 0, 0], sizes = [1, 1, 2, 128], strides = [1, 1, 1, 1]} : vector<1x21x2x128xbf16> to vector<1x1x2x128xbf16>
    %211 = vector.shape_cast %210 : vector<1x1x2x128xbf16> to vector<1x2x128xbf16>
    %212 = arith.extf %211 : vector<1x2x128xbf16> to vector<1x2x128xf32>
    %213 = arith.subf %212, %97 : vector<1x2x128xf32>
    %214 = math.exp %213 : vector<1x2x128xf32>
    %215 = arith.addf %204, %214 : vector<1x2x128xf32>
    %c10_i32 = arith.constant 10 : i32
    %216 = vector.broadcast %c10_i32 : i32 to vector<1x2x128xi32>
    %217 = arith.cmpi eq, %0, %216 : vector<1x2x128xi32>
    %cst_19 = arith.constant 0.000000e+00 : f32
    %218 = vector.broadcast %cst_19 : f32 to vector<1x2x128xf32>
    %219 = arith.select %217, %212, %218 : vector<1x2x128xi1>, vector<1x2x128xf32>
    %220 = arith.addf %209, %219 : vector<1x2x128xf32>
    %221 = vector.extract_strided_slice %1 {offsets = [0, 11, 0, 0], sizes = [1, 1, 2, 128], strides = [1, 1, 1, 1]} : vector<1x21x2x128xbf16> to vector<1x1x2x128xbf16>
    %222 = vector.shape_cast %221 : vector<1x1x2x128xbf16> to vector<1x2x128xbf16>
    %223 = arith.extf %222 : vector<1x2x128xbf16> to vector<1x2x128xf32>
    %224 = arith.subf %223, %97 : vector<1x2x128xf32>
    %225 = math.exp %224 : vector<1x2x128xf32>
    %226 = arith.addf %215, %225 : vector<1x2x128xf32>
    %c11_i32 = arith.constant 11 : i32
    %227 = vector.broadcast %c11_i32 : i32 to vector<1x2x128xi32>
    %228 = arith.cmpi eq, %0, %227 : vector<1x2x128xi32>
    %cst_20 = arith.constant 0.000000e+00 : f32
    %229 = vector.broadcast %cst_20 : f32 to vector<1x2x128xf32>
    %230 = arith.select %228, %223, %229 : vector<1x2x128xi1>, vector<1x2x128xf32>
    %231 = arith.addf %220, %230 : vector<1x2x128xf32>
    %232 = vector.extract_strided_slice %1 {offsets = [0, 12, 0, 0], sizes = [1, 1, 2, 128], strides = [1, 1, 1, 1]} : vector<1x21x2x128xbf16> to vector<1x1x2x128xbf16>
    %233 = vector.shape_cast %232 : vector<1x1x2x128xbf16> to vector<1x2x128xbf16>
    %234 = arith.extf %233 : vector<1x2x128xbf16> to vector<1x2x128xf32>
    %235 = arith.subf %234, %97 : vector<1x2x128xf32>
    %236 = math.exp %235 : vector<1x2x128xf32>
    %237 = arith.addf %226, %236 : vector<1x2x128xf32>
    %c12_i32 = arith.constant 12 : i32
    %238 = vector.broadcast %c12_i32 : i32 to vector<1x2x128xi32>
    %239 = arith.cmpi eq, %0, %238 : vector<1x2x128xi32>
    %cst_21 = arith.constant 0.000000e+00 : f32
    %240 = vector.broadcast %cst_21 : f32 to vector<1x2x128xf32>
    %241 = arith.select %239, %234, %240 : vector<1x2x128xi1>, vector<1x2x128xf32>
    %242 = arith.addf %231, %241 : vector<1x2x128xf32>
    %243 = vector.extract_strided_slice %1 {offsets = [0, 13, 0, 0], sizes = [1, 1, 2, 128], strides = [1, 1, 1, 1]} : vector<1x21x2x128xbf16> to vector<1x1x2x128xbf16>
    %244 = vector.shape_cast %243 : vector<1x1x2x128xbf16> to vector<1x2x128xbf16>
    %245 = arith.extf %244 : vector<1x2x128xbf16> to vector<1x2x128xf32>
    %246 = arith.subf %245, %97 : vector<1x2x128xf32>
    %247 = math.exp %246 : vector<1x2x128xf32>
    %248 = arith.addf %237, %247 : vector<1x2x128xf32>
    %c13_i32 = arith.constant 13 : i32
    %249 = vector.broadcast %c13_i32 : i32 to vector<1x2x128xi32>
    %250 = arith.cmpi eq, %0, %249 : vector<1x2x128xi32>
    %cst_22 = arith.constant 0.000000e+00 : f32
    %251 = vector.broadcast %cst_22 : f32 to vector<1x2x128xf32>
    %252 = arith.select %250, %245, %251 : vector<1x2x128xi1>, vector<1x2x128xf32>
    %253 = arith.addf %242, %252 : vector<1x2x128xf32>
    %254 = vector.extract_strided_slice %1 {offsets = [0, 14, 0, 0], sizes = [1, 1, 2, 128], strides = [1, 1, 1, 1]} : vector<1x21x2x128xbf16> to vector<1x1x2x128xbf16>
    %255 = vector.shape_cast %254 : vector<1x1x2x128xbf16> to vector<1x2x128xbf16>
    %256 = arith.extf %255 : vector<1x2x128xbf16> to vector<1x2x128xf32>
    %257 = arith.subf %256, %97 : vector<1x2x128xf32>
    %258 = math.exp %257 : vector<1x2x128xf32>
    %259 = arith.addf %248, %258 : vector<1x2x128xf32>
    %c14_i32 = arith.constant 14 : i32
    %260 = vector.broadcast %c14_i32 : i32 to vector<1x2x128xi32>
    %261 = arith.cmpi eq, %0, %260 : vector<1x2x128xi32>
    %cst_23 = arith.constant 0.000000e+00 : f32
    %262 = vector.broadcast %cst_23 : f32 to vector<1x2x128xf32>
    %263 = arith.select %261, %256, %262 : vector<1x2x128xi1>, vector<1x2x128xf32>
    %264 = arith.addf %253, %263 : vector<1x2x128xf32>
    %265 = vector.extract_strided_slice %1 {offsets = [0, 15, 0, 0], sizes = [1, 1, 2, 128], strides = [1, 1, 1, 1]} : vector<1x21x2x128xbf16> to vector<1x1x2x128xbf16>
    %266 = vector.shape_cast %265 : vector<1x1x2x128xbf16> to vector<1x2x128xbf16>
    %267 = arith.extf %266 : vector<1x2x128xbf16> to vector<1x2x128xf32>
    %268 = arith.subf %267, %97 : vector<1x2x128xf32>
    %269 = math.exp %268 : vector<1x2x128xf32>
    %270 = arith.addf %259, %269 : vector<1x2x128xf32>
    %c15_i32 = arith.constant 15 : i32
    %271 = vector.broadcast %c15_i32 : i32 to vector<1x2x128xi32>
    %272 = arith.cmpi eq, %0, %271 : vector<1x2x128xi32>
    %cst_24 = arith.constant 0.000000e+00 : f32
    %273 = vector.broadcast %cst_24 : f32 to vector<1x2x128xf32>
    %274 = arith.select %272, %267, %273 : vector<1x2x128xi1>, vector<1x2x128xf32>
    %275 = arith.addf %264, %274 : vector<1x2x128xf32>
    %276 = vector.extract_strided_slice %1 {offsets = [0, 16, 0, 0], sizes = [1, 1, 2, 128], strides = [1, 1, 1, 1]} : vector<1x21x2x128xbf16> to vector<1x1x2x128xbf16>
    %277 = vector.shape_cast %276 : vector<1x1x2x128xbf16> to vector<1x2x128xbf16>
    %278 = arith.extf %277 : vector<1x2x128xbf16> to vector<1x2x128xf32>
    %279 = arith.subf %278, %97 : vector<1x2x128xf32>
    %280 = math.exp %279 : vector<1x2x128xf32>
    %281 = arith.addf %270, %280 : vector<1x2x128xf32>
    %c16_i32 = arith.constant 16 : i32
    %282 = vector.broadcast %c16_i32 : i32 to vector<1x2x128xi32>
    %283 = arith.cmpi eq, %0, %282 : vector<1x2x128xi32>
    %cst_25 = arith.constant 0.000000e+00 : f32
    %284 = vector.broadcast %cst_25 : f32 to vector<1x2x128xf32>
    %285 = arith.select %283, %278, %284 : vector<1x2x128xi1>, vector<1x2x128xf32>
    %286 = arith.addf %275, %285 : vector<1x2x128xf32>
    %287 = vector.extract_strided_slice %1 {offsets = [0, 17, 0, 0], sizes = [1, 1, 2, 128], strides = [1, 1, 1, 1]} : vector<1x21x2x128xbf16> to vector<1x1x2x128xbf16>
    %288 = vector.shape_cast %287 : vector<1x1x2x128xbf16> to vector<1x2x128xbf16>
    %289 = arith.extf %288 : vector<1x2x128xbf16> to vector<1x2x128xf32>
    %290 = arith.subf %289, %97 : vector<1x2x128xf32>
    %291 = math.exp %290 : vector<1x2x128xf32>
    %292 = arith.addf %281, %291 : vector<1x2x128xf32>
    %c17_i32 = arith.constant 17 : i32
    %293 = vector.broadcast %c17_i32 : i32 to vector<1x2x128xi32>
    %294 = arith.cmpi eq, %0, %293 : vector<1x2x128xi32>
    %cst_26 = arith.constant 0.000000e+00 : f32
    %295 = vector.broadcast %cst_26 : f32 to vector<1x2x128xf32>
    %296 = arith.select %294, %289, %295 : vector<1x2x128xi1>, vector<1x2x128xf32>
    %297 = arith.addf %286, %296 : vector<1x2x128xf32>
    %298 = vector.extract_strided_slice %1 {offsets = [0, 18, 0, 0], sizes = [1, 1, 2, 128], strides = [1, 1, 1, 1]} : vector<1x21x2x128xbf16> to vector<1x1x2x128xbf16>
    %299 = vector.shape_cast %298 : vector<1x1x2x128xbf16> to vector<1x2x128xbf16>
    %300 = arith.extf %299 : vector<1x2x128xbf16> to vector<1x2x128xf32>
    %301 = arith.subf %300, %97 : vector<1x2x128xf32>
    %302 = math.exp %301 : vector<1x2x128xf32>
    %303 = arith.addf %292, %302 : vector<1x2x128xf32>
    %c18_i32 = arith.constant 18 : i32
    %304 = vector.broadcast %c18_i32 : i32 to vector<1x2x128xi32>
    %305 = arith.cmpi eq, %0, %304 : vector<1x2x128xi32>
    %cst_27 = arith.constant 0.000000e+00 : f32
    %306 = vector.broadcast %cst_27 : f32 to vector<1x2x128xf32>
    %307 = arith.select %305, %300, %306 : vector<1x2x128xi1>, vector<1x2x128xf32>
    %308 = arith.addf %297, %307 : vector<1x2x128xf32>
    %309 = vector.extract_strided_slice %1 {offsets = [0, 19, 0, 0], sizes = [1, 1, 2, 128], strides = [1, 1, 1, 1]} : vector<1x21x2x128xbf16> to vector<1x1x2x128xbf16>
    %310 = vector.shape_cast %309 : vector<1x1x2x128xbf16> to vector<1x2x128xbf16>
    %311 = arith.extf %310 : vector<1x2x128xbf16> to vector<1x2x128xf32>
    %312 = arith.subf %311, %97 : vector<1x2x128xf32>
    %313 = math.exp %312 : vector<1x2x128xf32>
    %314 = arith.addf %303, %313 : vector<1x2x128xf32>
    %c19_i32 = arith.constant 19 : i32
    %315 = vector.broadcast %c19_i32 : i32 to vector<1x2x128xi32>
    %316 = arith.cmpi eq, %0, %315 : vector<1x2x128xi32>
    %cst_28 = arith.constant 0.000000e+00 : f32
    %317 = vector.broadcast %cst_28 : f32 to vector<1x2x128xf32>
    %318 = arith.select %316, %311, %317 : vector<1x2x128xi1>, vector<1x2x128xf32>
    %319 = arith.addf %308, %318 : vector<1x2x128xf32>
    %320 = vector.extract_strided_slice %1 {offsets = [0, 20, 0, 0], sizes = [1, 1, 2, 128], strides = [1, 1, 1, 1]} : vector<1x21x2x128xbf16> to vector<1x1x2x128xbf16>
    %321 = vector.shape_cast %320 : vector<1x1x2x128xbf16> to vector<1x2x128xbf16>
    %322 = arith.extf %321 : vector<1x2x128xbf16> to vector<1x2x128xf32>
    %323 = arith.subf %322, %97 : vector<1x2x128xf32>
    %324 = math.exp %323 : vector<1x2x128xf32>
    %325 = arith.addf %314, %324 : vector<1x2x128xf32>
    %c20_i32 = arith.constant 20 : i32
    %326 = vector.broadcast %c20_i32 : i32 to vector<1x2x128xi32>
    %327 = arith.cmpi eq, %0, %326 : vector<1x2x128xi32>
    %cst_29 = arith.constant 0.000000e+00 : f32
    %328 = vector.broadcast %cst_29 : f32 to vector<1x2x128xf32>
    %329 = arith.select %327, %322, %328 : vector<1x2x128xi1>, vector<1x2x128xf32>
    %330 = arith.addf %319, %329 : vector<1x2x128xf32>
    %331 = math.log %325 : vector<1x2x128xf32>
    %332 = arith.addf %97, %331 : vector<1x2x128xf32>
    %333 = arith.subf %332, %330 : vector<1x2x128xf32>
    %cst_30 = arith.constant dense<true> : vector<1x2x128xi1>
    %334 = arith.xori %8, %cst_30 : vector<1x2x128xi1>
    %335 = arith.ori %10, %334 : vector<1x2x128xi1>
    %cst_31 = arith.constant 0.000000e+00 : f32
    %336 = vector.broadcast %cst_31 : f32 to vector<1x2x128xf32>
    %337 = arith.select %335, %336, %333 : vector<1x2x128xi1>, vector<1x2x128xf32>
    %cst_32 = arith.constant 0.000000e+00 : f32
    %338 = vector.broadcast %cst_32 : f32 to vector<1x2x128xf32>
    %339 = arith.cmpf ogt, %337, %338 : vector<1x2x128xf32>
    %cst_33 = arith.constant 0.000000e+00 : f32
    %340 = vector.broadcast %cst_33 : f32 to vector<1x2x128xf32>
    %341 = arith.select %339, %337, %340 : vector<1x2x128xi1>, vector<1x2x128xf32>
    %342 = tpu.bitcast %341 : vector<1x2x128xf32> -> vector<1x2x128xi32>
    %c11_i32_34 = arith.constant 11 : i32
    %343 = vector.broadcast %c11_i32_34 : i32 to vector<1x2x128xi32>
    %344 = arith.shrsi %342, %343 : vector<1x2x128xi32>
    %cst_35 = arith.constant 3.000000e+00 : f32
    %345 = vector.broadcast %cst_35 : f32 to vector<1x1x1xf32>
    %346 = arith.mulf %345, %14 : vector<1x1x1xf32>
    %cst_36 = arith.constant 1.990000e+02 : f32
    %347 = vector.broadcast %cst_36 : f32 to vector<1x1x1xf32>
    %348 = arith.minimumf %346, %347 : vector<1x1x1xf32>
    %c0_i32_37 = arith.constant 0 : i32
    %349 = vector.broadcast %c0_i32_37 : i32 to vector<1x1x1xi32>
    %c524288_i32 = arith.constant 524288 : i32
    %350 = vector.broadcast %c524288_i32 : i32 to vector<1x1x1xi32>
    %351 = arith.ori %349, %350 : vector<1x1x1xi32>
    %352 = vector.broadcast %351 : vector<1x1x1xi32> to vector<1x2x128xi32>
    %353 = arith.cmpi sge, %344, %352 : vector<1x2x128xi32>
    %cst_38 = arith.constant 1.000000e+00 : f32
    %cst_39 = arith.constant 0.000000e+00 : f32
    %354 = vector.broadcast %cst_38 : f32 to vector<1x2x128xf32>
    %355 = vector.broadcast %cst_39 : f32 to vector<1x2x128xf32>
    %356 = arith.select %353, %354, %355 : vector<1x2x128xi1>, vector<1x2x128xf32>
    %cst_40 = arith.constant dense<0.000000e+00> : vector<1xf32>
    %357 = vector.multi_reduction <add>, %356, %cst_40 [1, 2] : vector<1x2x128xf32> to vector<1xf32>
    %358 = vector.shape_cast %357 : vector<1xf32> to vector<1x1x1xf32>
    %359 = arith.cmpf oge, %358, %348 : vector<1x1x1xf32>
    %360 = arith.select %359, %351, %349 : vector<1x1x1xi1>, vector<1x1x1xi32>
    %c262144_i32 = arith.constant 262144 : i32
    %361 = vector.broadcast %c262144_i32 : i32 to vector<1x1x1xi32>
    %362 = arith.ori %360, %361 : vector<1x1x1xi32>
    %363 = vector.broadcast %362 : vector<1x1x1xi32> to vector<1x2x128xi32>
    %364 = arith.cmpi sge, %344, %363 : vector<1x2x128xi32>
    %cst_41 = arith.constant 1.000000e+00 : f32
    %cst_42 = arith.constant 0.000000e+00 : f32
    %365 = vector.broadcast %cst_41 : f32 to vector<1x2x128xf32>
    %366 = vector.broadcast %cst_42 : f32 to vector<1x2x128xf32>
    %367 = arith.select %364, %365, %366 : vector<1x2x128xi1>, vector<1x2x128xf32>
    %cst_43 = arith.constant dense<0.000000e+00> : vector<1xf32>
    %368 = vector.multi_reduction <add>, %367, %cst_43 [1, 2] : vector<1x2x128xf32> to vector<1xf32>
    %369 = vector.shape_cast %368 : vector<1xf32> to vector<1x1x1xf32>
    %370 = arith.cmpf oge, %369, %348 : vector<1x1x1xf32>
    %371 = arith.select %370, %362, %360 : vector<1x1x1xi1>, vector<1x1x1xi32>
    %c131072_i32 = arith.constant 131072 : i32
    %372 = vector.broadcast %c131072_i32 : i32 to vector<1x1x1xi32>
    %373 = arith.ori %371, %372 : vector<1x1x1xi32>
    %374 = vector.broadcast %373 : vector<1x1x1xi32> to vector<1x2x128xi32>
    %375 = arith.cmpi sge, %344, %374 : vector<1x2x128xi32>
    %cst_44 = arith.constant 1.000000e+00 : f32
    %cst_45 = arith.constant 0.000000e+00 : f32
    %376 = vector.broadcast %cst_44 : f32 to vector<1x2x128xf32>
    %377 = vector.broadcast %cst_45 : f32 to vector<1x2x128xf32>
    %378 = arith.select %375, %376, %377 : vector<1x2x128xi1>, vector<1x2x128xf32>
    %cst_46 = arith.constant dense<0.000000e+00> : vector<1xf32>
    %379 = vector.multi_reduction <add>, %378, %cst_46 [1, 2] : vector<1x2x128xf32> to vector<1xf32>
    %380 = vector.shape_cast %379 : vector<1xf32> to vector<1x1x1xf32>
    %381 = arith.cmpf oge, %380, %348 : vector<1x1x1xf32>
    %382 = arith.select %381, %373, %371 : vector<1x1x1xi1>, vector<1x1x1xi32>
    %c65536_i32 = arith.constant 65536 : i32
    %383 = vector.broadcast %c65536_i32 : i32 to vector<1x1x1xi32>
    %384 = arith.ori %382, %383 : vector<1x1x1xi32>
    %385 = vector.broadcast %384 : vector<1x1x1xi32> to vector<1x2x128xi32>
    %386 = arith.cmpi sge, %344, %385 : vector<1x2x128xi32>
    %cst_47 = arith.constant 1.000000e+00 : f32
    %cst_48 = arith.constant 0.000000e+00 : f32
    %387 = vector.broadcast %cst_47 : f32 to vector<1x2x128xf32>
    %388 = vector.broadcast %cst_48 : f32 to vector<1x2x128xf32>
    %389 = arith.select %386, %387, %388 : vector<1x2x128xi1>, vector<1x2x128xf32>
    %cst_49 = arith.constant dense<0.000000e+00> : vector<1xf32>
    %390 = vector.multi_reduction <add>, %389, %cst_49 [1, 2] : vector<1x2x128xf32> to vector<1xf32>
    %391 = vector.shape_cast %390 : vector<1xf32> to vector<1x1x1xf32>
    %392 = arith.cmpf oge, %391, %348 : vector<1x1x1xf32>
    %393 = arith.select %392, %384, %382 : vector<1x1x1xi1>, vector<1x1x1xi32>
    %c32768_i32 = arith.constant 32768 : i32
    %394 = vector.broadcast %c32768_i32 : i32 to vector<1x1x1xi32>
    %395 = arith.ori %393, %394 : vector<1x1x1xi32>
    %396 = vector.broadcast %395 : vector<1x1x1xi32> to vector<1x2x128xi32>
    %397 = arith.cmpi sge, %344, %396 : vector<1x2x128xi32>
    %cst_50 = arith.constant 1.000000e+00 : f32
    %cst_51 = arith.constant 0.000000e+00 : f32
    %398 = vector.broadcast %cst_50 : f32 to vector<1x2x128xf32>
    %399 = vector.broadcast %cst_51 : f32 to vector<1x2x128xf32>
    %400 = arith.select %397, %398, %399 : vector<1x2x128xi1>, vector<1x2x128xf32>
    %cst_52 = arith.constant dense<0.000000e+00> : vector<1xf32>
    %401 = vector.multi_reduction <add>, %400, %cst_52 [1, 2] : vector<1x2x128xf32> to vector<1xf32>
    %402 = vector.shape_cast %401 : vector<1xf32> to vector<1x1x1xf32>
    %403 = arith.cmpf oge, %402, %348 : vector<1x1x1xf32>
    %404 = arith.select %403, %395, %393 : vector<1x1x1xi1>, vector<1x1x1xi32>
    %c16384_i32 = arith.constant 16384 : i32
    %405 = vector.broadcast %c16384_i32 : i32 to vector<1x1x1xi32>
    %406 = arith.ori %404, %405 : vector<1x1x1xi32>
    %407 = vector.broadcast %406 : vector<1x1x1xi32> to vector<1x2x128xi32>
    %408 = arith.cmpi sge, %344, %407 : vector<1x2x128xi32>
    %cst_53 = arith.constant 1.000000e+00 : f32
    %cst_54 = arith.constant 0.000000e+00 : f32
    %409 = vector.broadcast %cst_53 : f32 to vector<1x2x128xf32>
    %410 = vector.broadcast %cst_54 : f32 to vector<1x2x128xf32>
    %411 = arith.select %408, %409, %410 : vector<1x2x128xi1>, vector<1x2x128xf32>
    %cst_55 = arith.constant dense<0.000000e+00> : vector<1xf32>
    %412 = vector.multi_reduction <add>, %411, %cst_55 [1, 2] : vector<1x2x128xf32> to vector<1xf32>
    %413 = vector.shape_cast %412 : vector<1xf32> to vector<1x1x1xf32>
    %414 = arith.cmpf oge, %413, %348 : vector<1x1x1xf32>
    %415 = arith.select %414, %406, %404 : vector<1x1x1xi1>, vector<1x1x1xi32>
    %c8192_i32 = arith.constant 8192 : i32
    %416 = vector.broadcast %c8192_i32 : i32 to vector<1x1x1xi32>
    %417 = arith.ori %415, %416 : vector<1x1x1xi32>
    %418 = vector.broadcast %417 : vector<1x1x1xi32> to vector<1x2x128xi32>
    %419 = arith.cmpi sge, %344, %418 : vector<1x2x128xi32>
    %cst_56 = arith.constant 1.000000e+00 : f32
    %cst_57 = arith.constant 0.000000e+00 : f32
    %420 = vector.broadcast %cst_56 : f32 to vector<1x2x128xf32>
    %421 = vector.broadcast %cst_57 : f32 to vector<1x2x128xf32>
    %422 = arith.select %419, %420, %421 : vector<1x2x128xi1>, vector<1x2x128xf32>
    %cst_58 = arith.constant dense<0.000000e+00> : vector<1xf32>
    %423 = vector.multi_reduction <add>, %422, %cst_58 [1, 2] : vector<1x2x128xf32> to vector<1xf32>
    %424 = vector.shape_cast %423 : vector<1xf32> to vector<1x1x1xf32>
    %425 = arith.cmpf oge, %424, %348 : vector<1x1x1xf32>
    %426 = arith.select %425, %417, %415 : vector<1x1x1xi1>, vector<1x1x1xi32>
    %c4096_i32 = arith.constant 4096 : i32
    %427 = vector.broadcast %c4096_i32 : i32 to vector<1x1x1xi32>
    %428 = arith.ori %426, %427 : vector<1x1x1xi32>
    %429 = vector.broadcast %428 : vector<1x1x1xi32> to vector<1x2x128xi32>
    %430 = arith.cmpi sge, %344, %429 : vector<1x2x128xi32>
    %cst_59 = arith.constant 1.000000e+00 : f32
    %cst_60 = arith.constant 0.000000e+00 : f32
    %431 = vector.broadcast %cst_59 : f32 to vector<1x2x128xf32>
    %432 = vector.broadcast %cst_60 : f32 to vector<1x2x128xf32>
    %433 = arith.select %430, %431, %432 : vector<1x2x128xi1>, vector<1x2x128xf32>
    %cst_61 = arith.constant dense<0.000000e+00> : vector<1xf32>
    %434 = vector.multi_reduction <add>, %433, %cst_61 [1, 2] : vector<1x2x128xf32> to vector<1xf32>
    %435 = vector.shape_cast %434 : vector<1xf32> to vector<1x1x1xf32>
    %436 = arith.cmpf oge, %435, %348 : vector<1x1x1xf32>
    %437 = arith.select %436, %428, %426 : vector<1x1x1xi1>, vector<1x1x1xi32>
    %c2048_i32 = arith.constant 2048 : i32
    %438 = vector.broadcast %c2048_i32 : i32 to vector<1x1x1xi32>
    %439 = arith.ori %437, %438 : vector<1x1x1xi32>
    %440 = vector.broadcast %439 : vector<1x1x1xi32> to vector<1x2x128xi32>
    %441 = arith.cmpi sge, %344, %440 : vector<1x2x128xi32>
    %cst_62 = arith.constant 1.000000e+00 : f32
    %cst_63 = arith.constant 0.000000e+00 : f32
    %442 = vector.broadcast %cst_62 : f32 to vector<1x2x128xf32>
    %443 = vector.broadcast %cst_63 : f32 to vector<1x2x128xf32>
    %444 = arith.select %441, %442, %443 : vector<1x2x128xi1>, vector<1x2x128xf32>
    %cst_64 = arith.constant dense<0.000000e+00> : vector<1xf32>
    %445 = vector.multi_reduction <add>, %444, %cst_64 [1, 2] : vector<1x2x128xf32> to vector<1xf32>
    %446 = vector.shape_cast %445 : vector<1xf32> to vector<1x1x1xf32>
    %447 = arith.cmpf oge, %446, %348 : vector<1x1x1xf32>
    %448 = arith.select %447, %439, %437 : vector<1x1x1xi1>, vector<1x1x1xi32>
    %c1024_i32 = arith.constant 1024 : i32
    %449 = vector.broadcast %c1024_i32 : i32 to vector<1x1x1xi32>
    %450 = arith.ori %448, %449 : vector<1x1x1xi32>
    %451 = vector.broadcast %450 : vector<1x1x1xi32> to vector<1x2x128xi32>
    %452 = arith.cmpi sge, %344, %451 : vector<1x2x128xi32>
    %cst_65 = arith.constant 1.000000e+00 : f32
    %cst_66 = arith.constant 0.000000e+00 : f32
    %453 = vector.broadcast %cst_65 : f32 to vector<1x2x128xf32>
    %454 = vector.broadcast %cst_66 : f32 to vector<1x2x128xf32>
    %455 = arith.select %452, %453, %454 : vector<1x2x128xi1>, vector<1x2x128xf32>
    %cst_67 = arith.constant dense<0.000000e+00> : vector<1xf32>
    %456 = vector.multi_reduction <add>, %455, %cst_67 [1, 2] : vector<1x2x128xf32> to vector<1xf32>
    %457 = vector.shape_cast %456 : vector<1xf32> to vector<1x1x1xf32>
    %458 = arith.cmpf oge, %457, %348 : vector<1x1x1xf32>
    %459 = arith.select %458, %450, %448 : vector<1x1x1xi1>, vector<1x1x1xi32>
    %c512_i32 = arith.constant 512 : i32
    %460 = vector.broadcast %c512_i32 : i32 to vector<1x1x1xi32>
    %461 = arith.ori %459, %460 : vector<1x1x1xi32>
    %462 = vector.broadcast %461 : vector<1x1x1xi32> to vector<1x2x128xi32>
    %463 = arith.cmpi sge, %344, %462 : vector<1x2x128xi32>
    %cst_68 = arith.constant 1.000000e+00 : f32
    %cst_69 = arith.constant 0.000000e+00 : f32
    %464 = vector.broadcast %cst_68 : f32 to vector<1x2x128xf32>
    %465 = vector.broadcast %cst_69 : f32 to vector<1x2x128xf32>
    %466 = arith.select %463, %464, %465 : vector<1x2x128xi1>, vector<1x2x128xf32>
    %cst_70 = arith.constant dense<0.000000e+00> : vector<1xf32>
    %467 = vector.multi_reduction <add>, %466, %cst_70 [1, 2] : vector<1x2x128xf32> to vector<1xf32>
    %468 = vector.shape_cast %467 : vector<1xf32> to vector<1x1x1xf32>
    %469 = arith.cmpf oge, %468, %348 : vector<1x1x1xf32>
    %470 = arith.select %469, %461, %459 : vector<1x1x1xi1>, vector<1x1x1xi32>
    %c256_i32 = arith.constant 256 : i32
    %471 = vector.broadcast %c256_i32 : i32 to vector<1x1x1xi32>
    %472 = arith.ori %470, %471 : vector<1x1x1xi32>
    %473 = vector.broadcast %472 : vector<1x1x1xi32> to vector<1x2x128xi32>
    %474 = arith.cmpi sge, %344, %473 : vector<1x2x128xi32>
    %cst_71 = arith.constant 1.000000e+00 : f32
    %cst_72 = arith.constant 0.000000e+00 : f32
    %475 = vector.broadcast %cst_71 : f32 to vector<1x2x128xf32>
    %476 = vector.broadcast %cst_72 : f32 to vector<1x2x128xf32>
    %477 = arith.select %474, %475, %476 : vector<1x2x128xi1>, vector<1x2x128xf32>
    %cst_73 = arith.constant dense<0.000000e+00> : vector<1xf32>
    %478 = vector.multi_reduction <add>, %477, %cst_73 [1, 2] : vector<1x2x128xf32> to vector<1xf32>
    %479 = vector.shape_cast %478 : vector<1xf32> to vector<1x1x1xf32>
    %480 = arith.cmpf oge, %479, %348 : vector<1x1x1xf32>
    %481 = arith.select %480, %472, %470 : vector<1x1x1xi1>, vector<1x1x1xi32>
    %c128_i32_74 = arith.constant 128 : i32
    %482 = vector.broadcast %c128_i32_74 : i32 to vector<1x1x1xi32>
    %483 = arith.ori %481, %482 : vector<1x1x1xi32>
    %484 = vector.broadcast %483 : vector<1x1x1xi32> to vector<1x2x128xi32>
    %485 = arith.cmpi sge, %344, %484 : vector<1x2x128xi32>
    %cst_75 = arith.constant 1.000000e+00 : f32
    %cst_76 = arith.constant 0.000000e+00 : f32
    %486 = vector.broadcast %cst_75 : f32 to vector<1x2x128xf32>
    %487 = vector.broadcast %cst_76 : f32 to vector<1x2x128xf32>
    %488 = arith.select %485, %486, %487 : vector<1x2x128xi1>, vector<1x2x128xf32>
    %cst_77 = arith.constant dense<0.000000e+00> : vector<1xf32>
    %489 = vector.multi_reduction <add>, %488, %cst_77 [1, 2] : vector<1x2x128xf32> to vector<1xf32>
    %490 = vector.shape_cast %489 : vector<1xf32> to vector<1x1x1xf32>
    %491 = arith.cmpf oge, %490, %348 : vector<1x1x1xf32>
    %492 = arith.select %491, %483, %481 : vector<1x1x1xi1>, vector<1x1x1xi32>
    %c64_i32 = arith.constant 64 : i32
    %493 = vector.broadcast %c64_i32 : i32 to vector<1x1x1xi32>
    %494 = arith.ori %492, %493 : vector<1x1x1xi32>
    %495 = vector.broadcast %494 : vector<1x1x1xi32> to vector<1x2x128xi32>
    %496 = arith.cmpi sge, %344, %495 : vector<1x2x128xi32>
    %cst_78 = arith.constant 1.000000e+00 : f32
    %cst_79 = arith.constant 0.000000e+00 : f32
    %497 = vector.broadcast %cst_78 : f32 to vector<1x2x128xf32>
    %498 = vector.broadcast %cst_79 : f32 to vector<1x2x128xf32>
    %499 = arith.select %496, %497, %498 : vector<1x2x128xi1>, vector<1x2x128xf32>
    %cst_80 = arith.constant dense<0.000000e+00> : vector<1xf32>
    %500 = vector.multi_reduction <add>, %499, %cst_80 [1, 2] : vector<1x2x128xf32> to vector<1xf32>
    %501 = vector.shape_cast %500 : vector<1xf32> to vector<1x1x1xf32>
    %502 = arith.cmpf oge, %501, %348 : vector<1x1x1xf32>
    %503 = arith.select %502, %494, %492 : vector<1x1x1xi1>, vector<1x1x1xi32>
    %c32_i32 = arith.constant 32 : i32
    %504 = vector.broadcast %c32_i32 : i32 to vector<1x1x1xi32>
    %505 = arith.ori %503, %504 : vector<1x1x1xi32>
    %506 = vector.broadcast %505 : vector<1x1x1xi32> to vector<1x2x128xi32>
    %507 = arith.cmpi sge, %344, %506 : vector<1x2x128xi32>
    %cst_81 = arith.constant 1.000000e+00 : f32
    %cst_82 = arith.constant 0.000000e+00 : f32
    %508 = vector.broadcast %cst_81 : f32 to vector<1x2x128xf32>
    %509 = vector.broadcast %cst_82 : f32 to vector<1x2x128xf32>
    %510 = arith.select %507, %508, %509 : vector<1x2x128xi1>, vector<1x2x128xf32>
    %cst_83 = arith.constant dense<0.000000e+00> : vector<1xf32>
    %511 = vector.multi_reduction <add>, %510, %cst_83 [1, 2] : vector<1x2x128xf32> to vector<1xf32>
    %512 = vector.shape_cast %511 : vector<1xf32> to vector<1x1x1xf32>
    %513 = arith.cmpf oge, %512, %348 : vector<1x1x1xf32>
    %514 = arith.select %513, %505, %503 : vector<1x1x1xi1>, vector<1x1x1xi32>
    %c16_i32_84 = arith.constant 16 : i32
    %515 = vector.broadcast %c16_i32_84 : i32 to vector<1x1x1xi32>
    %516 = arith.ori %514, %515 : vector<1x1x1xi32>
    %517 = vector.broadcast %516 : vector<1x1x1xi32> to vector<1x2x128xi32>
    %518 = arith.cmpi sge, %344, %517 : vector<1x2x128xi32>
    %cst_85 = arith.constant 1.000000e+00 : f32
    %cst_86 = arith.constant 0.000000e+00 : f32
    %519 = vector.broadcast %cst_85 : f32 to vector<1x2x128xf32>
    %520 = vector.broadcast %cst_86 : f32 to vector<1x2x128xf32>
    %521 = arith.select %518, %519, %520 : vector<1x2x128xi1>, vector<1x2x128xf32>
    %cst_87 = arith.constant dense<0.000000e+00> : vector<1xf32>
    %522 = vector.multi_reduction <add>, %521, %cst_87 [1, 2] : vector<1x2x128xf32> to vector<1xf32>
    %523 = vector.shape_cast %522 : vector<1xf32> to vector<1x1x1xf32>
    %524 = arith.cmpf oge, %523, %348 : vector<1x1x1xf32>
    %525 = arith.select %524, %516, %514 : vector<1x1x1xi1>, vector<1x1x1xi32>
    %c8_i32_88 = arith.constant 8 : i32
    %526 = vector.broadcast %c8_i32_88 : i32 to vector<1x1x1xi32>
    %527 = arith.ori %525, %526 : vector<1x1x1xi32>
    %528 = vector.broadcast %527 : vector<1x1x1xi32> to vector<1x2x128xi32>
    %529 = arith.cmpi sge, %344, %528 : vector<1x2x128xi32>
    %cst_89 = arith.constant 1.000000e+00 : f32
    %cst_90 = arith.constant 0.000000e+00 : f32
    %530 = vector.broadcast %cst_89 : f32 to vector<1x2x128xf32>
    %531 = vector.broadcast %cst_90 : f32 to vector<1x2x128xf32>
    %532 = arith.select %529, %530, %531 : vector<1x2x128xi1>, vector<1x2x128xf32>
    %cst_91 = arith.constant dense<0.000000e+00> : vector<1xf32>
    %533 = vector.multi_reduction <add>, %532, %cst_91 [1, 2] : vector<1x2x128xf32> to vector<1xf32>
    %534 = vector.shape_cast %533 : vector<1xf32> to vector<1x1x1xf32>
    %535 = arith.cmpf oge, %534, %348 : vector<1x1x1xf32>
    %536 = arith.select %535, %527, %525 : vector<1x1x1xi1>, vector<1x1x1xi32>
    %c4_i32_92 = arith.constant 4 : i32
    %537 = vector.broadcast %c4_i32_92 : i32 to vector<1x1x1xi32>
    %538 = arith.ori %536, %537 : vector<1x1x1xi32>
    %539 = vector.broadcast %538 : vector<1x1x1xi32> to vector<1x2x128xi32>
    %540 = arith.cmpi sge, %344, %539 : vector<1x2x128xi32>
    %cst_93 = arith.constant 1.000000e+00 : f32
    %cst_94 = arith.constant 0.000000e+00 : f32
    %541 = vector.broadcast %cst_93 : f32 to vector<1x2x128xf32>
    %542 = vector.broadcast %cst_94 : f32 to vector<1x2x128xf32>
    %543 = arith.select %540, %541, %542 : vector<1x2x128xi1>, vector<1x2x128xf32>
    %cst_95 = arith.constant dense<0.000000e+00> : vector<1xf32>
    %544 = vector.multi_reduction <add>, %543, %cst_95 [1, 2] : vector<1x2x128xf32> to vector<1xf32>
    %545 = vector.shape_cast %544 : vector<1xf32> to vector<1x1x1xf32>
    %546 = arith.cmpf oge, %545, %348 : vector<1x1x1xf32>
    %547 = arith.select %546, %538, %536 : vector<1x1x1xi1>, vector<1x1x1xi32>
    %c2_i32_96 = arith.constant 2 : i32
    %548 = vector.broadcast %c2_i32_96 : i32 to vector<1x1x1xi32>
    %549 = arith.ori %547, %548 : vector<1x1x1xi32>
    %550 = vector.broadcast %549 : vector<1x1x1xi32> to vector<1x2x128xi32>
    %551 = arith.cmpi sge, %344, %550 : vector<1x2x128xi32>
    %cst_97 = arith.constant 1.000000e+00 : f32
    %cst_98 = arith.constant 0.000000e+00 : f32
    %552 = vector.broadcast %cst_97 : f32 to vector<1x2x128xf32>
    %553 = vector.broadcast %cst_98 : f32 to vector<1x2x128xf32>
    %554 = arith.select %551, %552, %553 : vector<1x2x128xi1>, vector<1x2x128xf32>
    %cst_99 = arith.constant dense<0.000000e+00> : vector<1xf32>
    %555 = vector.multi_reduction <add>, %554, %cst_99 [1, 2] : vector<1x2x128xf32> to vector<1xf32>
    %556 = vector.shape_cast %555 : vector<1xf32> to vector<1x1x1xf32>
    %557 = arith.cmpf oge, %556, %348 : vector<1x1x1xf32>
    %558 = arith.select %557, %549, %547 : vector<1x1x1xi1>, vector<1x1x1xi32>
    %c1_i32_100 = arith.constant 1 : i32
    %559 = vector.broadcast %c1_i32_100 : i32 to vector<1x1x1xi32>
    %560 = arith.ori %558, %559 : vector<1x1x1xi32>
    %561 = vector.broadcast %560 : vector<1x1x1xi32> to vector<1x2x128xi32>
    %562 = arith.cmpi sge, %344, %561 : vector<1x2x128xi32>
    %cst_101 = arith.constant 1.000000e+00 : f32
    %cst_102 = arith.constant 0.000000e+00 : f32
    %563 = vector.broadcast %cst_101 : f32 to vector<1x2x128xf32>
    %564 = vector.broadcast %cst_102 : f32 to vector<1x2x128xf32>
    %565 = arith.select %562, %563, %564 : vector<1x2x128xi1>, vector<1x2x128xf32>
    %cst_103 = arith.constant dense<0.000000e+00> : vector<1xf32>
    %566 = vector.multi_reduction <add>, %565, %cst_103 [1, 2] : vector<1x2x128xf32> to vector<1xf32>
    %567 = vector.shape_cast %566 : vector<1xf32> to vector<1x1x1xf32>
    %568 = arith.cmpf oge, %567, %348 : vector<1x1x1xf32>
    %569 = arith.select %568, %560, %558 : vector<1x1x1xi1>, vector<1x1x1xi32>
    %570 = vector.broadcast %569 : vector<1x1x1xi32> to vector<1x2x128xi32>
    %571 = arith.cmpi sgt, %344, %570 : vector<1x2x128xi32>
    %572 = vector.broadcast %569 : vector<1x1x1xi32> to vector<1x2x128xi32>
    %573 = arith.cmpi eq, %344, %572 : vector<1x2x128xi32>
    %cst_104 = arith.constant 1.000000e+00 : f32
    %cst_105 = arith.constant 0.000000e+00 : f32
    %574 = vector.broadcast %cst_104 : f32 to vector<1x2x128xf32>
    %575 = vector.broadcast %cst_105 : f32 to vector<1x2x128xf32>
    %576 = arith.select %571, %574, %575 : vector<1x2x128xi1>, vector<1x2x128xf32>
    %cst_106 = arith.constant dense<0.000000e+00> : vector<1xf32>
    %577 = vector.multi_reduction <add>, %576, %cst_106 [1, 2] : vector<1x2x128xf32> to vector<1xf32>
    %578 = vector.shape_cast %577 : vector<1xf32> to vector<1x1x1xf32>
    %579 = arith.subf %348, %578 : vector<1x1x1xf32>
    %580 = arith.andi %573, %8 : vector<1x2x128xi1>
    %c256_i32_107 = arith.constant 256 : i32
    %581 = vector.broadcast %c256_i32_107 : i32 to vector<1x2x128xi32>
    %582 = arith.subi %581, %6 : vector<1x2x128xi32>
    %c0_i32_108 = arith.constant 0 : i32
    %583 = vector.broadcast %c0_i32_108 : i32 to vector<1x2x128xi32>
    %584 = arith.select %580, %582, %583 : vector<1x2x128xi1>, vector<1x2x128xi32>
    %c0_i32_109 = arith.constant 0 : i32
    %585 = vector.broadcast %c0_i32_109 : i32 to vector<1x1x1xi32>
    %c256_i32_110 = arith.constant 256 : i32
    %586 = vector.broadcast %c256_i32_110 : i32 to vector<1x1x1xi32>
    %587 = arith.ori %585, %586 : vector<1x1x1xi32>
    %588 = vector.broadcast %587 : vector<1x1x1xi32> to vector<1x2x128xi32>
    %589 = arith.cmpi sge, %584, %588 : vector<1x2x128xi32>
    %cst_111 = arith.constant 1.000000e+00 : f32
    %cst_112 = arith.constant 0.000000e+00 : f32
    %590 = vector.broadcast %cst_111 : f32 to vector<1x2x128xf32>
    %591 = vector.broadcast %cst_112 : f32 to vector<1x2x128xf32>
    %592 = arith.select %589, %590, %591 : vector<1x2x128xi1>, vector<1x2x128xf32>
    %cst_113 = arith.constant dense<0.000000e+00> : vector<1xf32>
    %593 = vector.multi_reduction <add>, %592, %cst_113 [1, 2] : vector<1x2x128xf32> to vector<1xf32>
    %594 = vector.shape_cast %593 : vector<1xf32> to vector<1x1x1xf32>
    %595 = arith.cmpf oge, %594, %579 : vector<1x1x1xf32>
    %596 = arith.select %595, %587, %585 : vector<1x1x1xi1>, vector<1x1x1xi32>
    %c128_i32_114 = arith.constant 128 : i32
    %597 = vector.broadcast %c128_i32_114 : i32 to vector<1x1x1xi32>
    %598 = arith.ori %596, %597 : vector<1x1x1xi32>
    %599 = vector.broadcast %598 : vector<1x1x1xi32> to vector<1x2x128xi32>
    %600 = arith.cmpi sge, %584, %599 : vector<1x2x128xi32>
    %cst_115 = arith.constant 1.000000e+00 : f32
    %cst_116 = arith.constant 0.000000e+00 : f32
    %601 = vector.broadcast %cst_115 : f32 to vector<1x2x128xf32>
    %602 = vector.broadcast %cst_116 : f32 to vector<1x2x128xf32>
    %603 = arith.select %600, %601, %602 : vector<1x2x128xi1>, vector<1x2x128xf32>
    %cst_117 = arith.constant dense<0.000000e+00> : vector<1xf32>
    %604 = vector.multi_reduction <add>, %603, %cst_117 [1, 2] : vector<1x2x128xf32> to vector<1xf32>
    %605 = vector.shape_cast %604 : vector<1xf32> to vector<1x1x1xf32>
    %606 = arith.cmpf oge, %605, %579 : vector<1x1x1xf32>
    %607 = arith.select %606, %598, %596 : vector<1x1x1xi1>, vector<1x1x1xi32>
    %c64_i32_118 = arith.constant 64 : i32
    %608 = vector.broadcast %c64_i32_118 : i32 to vector<1x1x1xi32>
    %609 = arith.ori %607, %608 : vector<1x1x1xi32>
    %610 = vector.broadcast %609 : vector<1x1x1xi32> to vector<1x2x128xi32>
    %611 = arith.cmpi sge, %584, %610 : vector<1x2x128xi32>
    %cst_119 = arith.constant 1.000000e+00 : f32
    %cst_120 = arith.constant 0.000000e+00 : f32
    %612 = vector.broadcast %cst_119 : f32 to vector<1x2x128xf32>
    %613 = vector.broadcast %cst_120 : f32 to vector<1x2x128xf32>
    %614 = arith.select %611, %612, %613 : vector<1x2x128xi1>, vector<1x2x128xf32>
    %cst_121 = arith.constant dense<0.000000e+00> : vector<1xf32>
    %615 = vector.multi_reduction <add>, %614, %cst_121 [1, 2] : vector<1x2x128xf32> to vector<1xf32>
    %616 = vector.shape_cast %615 : vector<1xf32> to vector<1x1x1xf32>
    %617 = arith.cmpf oge, %616, %579 : vector<1x1x1xf32>
    %618 = arith.select %617, %609, %607 : vector<1x1x1xi1>, vector<1x1x1xi32>
    %c32_i32_122 = arith.constant 32 : i32
    %619 = vector.broadcast %c32_i32_122 : i32 to vector<1x1x1xi32>
    %620 = arith.ori %618, %619 : vector<1x1x1xi32>
    %621 = vector.broadcast %620 : vector<1x1x1xi32> to vector<1x2x128xi32>
    %622 = arith.cmpi sge, %584, %621 : vector<1x2x128xi32>
    %cst_123 = arith.constant 1.000000e+00 : f32
    %cst_124 = arith.constant 0.000000e+00 : f32
    %623 = vector.broadcast %cst_123 : f32 to vector<1x2x128xf32>
    %624 = vector.broadcast %cst_124 : f32 to vector<1x2x128xf32>
    %625 = arith.select %622, %623, %624 : vector<1x2x128xi1>, vector<1x2x128xf32>
    %cst_125 = arith.constant dense<0.000000e+00> : vector<1xf32>
    %626 = vector.multi_reduction <add>, %625, %cst_125 [1, 2] : vector<1x2x128xf32> to vector<1xf32>
    %627 = vector.shape_cast %626 : vector<1xf32> to vector<1x1x1xf32>
    %628 = arith.cmpf oge, %627, %579 : vector<1x1x1xf32>
    %629 = arith.select %628, %620, %618 : vector<1x1x1xi1>, vector<1x1x1xi32>
    %c16_i32_126 = arith.constant 16 : i32
    %630 = vector.broadcast %c16_i32_126 : i32 to vector<1x1x1xi32>
    %631 = arith.ori %629, %630 : vector<1x1x1xi32>
    %632 = vector.broadcast %631 : vector<1x1x1xi32> to vector<1x2x128xi32>
    %633 = arith.cmpi sge, %584, %632 : vector<1x2x128xi32>
    %cst_127 = arith.constant 1.000000e+00 : f32
    %cst_128 = arith.constant 0.000000e+00 : f32
    %634 = vector.broadcast %cst_127 : f32 to vector<1x2x128xf32>
    %635 = vector.broadcast %cst_128 : f32 to vector<1x2x128xf32>
    %636 = arith.select %633, %634, %635 : vector<1x2x128xi1>, vector<1x2x128xf32>
    %cst_129 = arith.constant dense<0.000000e+00> : vector<1xf32>
    %637 = vector.multi_reduction <add>, %636, %cst_129 [1, 2] : vector<1x2x128xf32> to vector<1xf32>
    %638 = vector.shape_cast %637 : vector<1xf32> to vector<1x1x1xf32>
    %639 = arith.cmpf oge, %638, %579 : vector<1x1x1xf32>
    %640 = arith.select %639, %631, %629 : vector<1x1x1xi1>, vector<1x1x1xi32>
    %c8_i32_130 = arith.constant 8 : i32
    %641 = vector.broadcast %c8_i32_130 : i32 to vector<1x1x1xi32>
    %642 = arith.ori %640, %641 : vector<1x1x1xi32>
    %643 = vector.broadcast %642 : vector<1x1x1xi32> to vector<1x2x128xi32>
    %644 = arith.cmpi sge, %584, %643 : vector<1x2x128xi32>
    %cst_131 = arith.constant 1.000000e+00 : f32
    %cst_132 = arith.constant 0.000000e+00 : f32
    %645 = vector.broadcast %cst_131 : f32 to vector<1x2x128xf32>
    %646 = vector.broadcast %cst_132 : f32 to vector<1x2x128xf32>
    %647 = arith.select %644, %645, %646 : vector<1x2x128xi1>, vector<1x2x128xf32>
    %cst_133 = arith.constant dense<0.000000e+00> : vector<1xf32>
    %648 = vector.multi_reduction <add>, %647, %cst_133 [1, 2] : vector<1x2x128xf32> to vector<1xf32>
    %649 = vector.shape_cast %648 : vector<1xf32> to vector<1x1x1xf32>
    %650 = arith.cmpf oge, %649, %579 : vector<1x1x1xf32>
    %651 = arith.select %650, %642, %640 : vector<1x1x1xi1>, vector<1x1x1xi32>
    %c4_i32_134 = arith.constant 4 : i32
    %652 = vector.broadcast %c4_i32_134 : i32 to vector<1x1x1xi32>
    %653 = arith.ori %651, %652 : vector<1x1x1xi32>
    %654 = vector.broadcast %653 : vector<1x1x1xi32> to vector<1x2x128xi32>
    %655 = arith.cmpi sge, %584, %654 : vector<1x2x128xi32>
    %cst_135 = arith.constant 1.000000e+00 : f32
    %cst_136 = arith.constant 0.000000e+00 : f32
    %656 = vector.broadcast %cst_135 : f32 to vector<1x2x128xf32>
    %657 = vector.broadcast %cst_136 : f32 to vector<1x2x128xf32>
    %658 = arith.select %655, %656, %657 : vector<1x2x128xi1>, vector<1x2x128xf32>
    %cst_137 = arith.constant dense<0.000000e+00> : vector<1xf32>
    %659 = vector.multi_reduction <add>, %658, %cst_137 [1, 2] : vector<1x2x128xf32> to vector<1xf32>
    %660 = vector.shape_cast %659 : vector<1xf32> to vector<1x1x1xf32>
    %661 = arith.cmpf oge, %660, %579 : vector<1x1x1xf32>
    %662 = arith.select %661, %653, %651 : vector<1x1x1xi1>, vector<1x1x1xi32>
    %c2_i32_138 = arith.constant 2 : i32
    %663 = vector.broadcast %c2_i32_138 : i32 to vector<1x1x1xi32>
    %664 = arith.ori %662, %663 : vector<1x1x1xi32>
    %665 = vector.broadcast %664 : vector<1x1x1xi32> to vector<1x2x128xi32>
    %666 = arith.cmpi sge, %584, %665 : vector<1x2x128xi32>
    %cst_139 = arith.constant 1.000000e+00 : f32
    %cst_140 = arith.constant 0.000000e+00 : f32
    %667 = vector.broadcast %cst_139 : f32 to vector<1x2x128xf32>
    %668 = vector.broadcast %cst_140 : f32 to vector<1x2x128xf32>
    %669 = arith.select %666, %667, %668 : vector<1x2x128xi1>, vector<1x2x128xf32>
    %cst_141 = arith.constant dense<0.000000e+00> : vector<1xf32>
    %670 = vector.multi_reduction <add>, %669, %cst_141 [1, 2] : vector<1x2x128xf32> to vector<1xf32>
    %671 = vector.shape_cast %670 : vector<1xf32> to vector<1x1x1xf32>
    %672 = arith.cmpf oge, %671, %579 : vector<1x1x1xf32>
    %673 = arith.select %672, %664, %662 : vector<1x1x1xi1>, vector<1x1x1xi32>
    %c1_i32_142 = arith.constant 1 : i32
    %674 = vector.broadcast %c1_i32_142 : i32 to vector<1x1x1xi32>
    %675 = arith.ori %673, %674 : vector<1x1x1xi32>
    %676 = vector.broadcast %675 : vector<1x1x1xi32> to vector<1x2x128xi32>
    %677 = arith.cmpi sge, %584, %676 : vector<1x2x128xi32>
    %cst_143 = arith.constant 1.000000e+00 : f32
    %cst_144 = arith.constant 0.000000e+00 : f32
    %678 = vector.broadcast %cst_143 : f32 to vector<1x2x128xf32>
    %679 = vector.broadcast %cst_144 : f32 to vector<1x2x128xf32>
    %680 = arith.select %677, %678, %679 : vector<1x2x128xi1>, vector<1x2x128xf32>
    %cst_145 = arith.constant dense<0.000000e+00> : vector<1xf32>
    %681 = vector.multi_reduction <add>, %680, %cst_145 [1, 2] : vector<1x2x128xf32> to vector<1xf32>
    %682 = vector.shape_cast %681 : vector<1xf32> to vector<1x1x1xf32>
    %683 = arith.cmpf oge, %682, %579 : vector<1x1x1xf32>
    %684 = arith.select %683, %675, %673 : vector<1x1x1xi1>, vector<1x1x1xi32>
    %685 = arith.andi %573, %8 : vector<1x2x128xi1>
    %686 = vector.broadcast %684 : vector<1x1x1xi32> to vector<1x2x128xi32>
    %687 = arith.cmpi sge, %584, %686 : vector<1x2x128xi32>
    %688 = arith.andi %685, %687 : vector<1x2x128xi1>
    %689 = arith.ori %571, %688 : vector<1x2x128xi1>
    %690 = arith.ori %10, %689 : vector<1x2x128xi1>
    %691 = arith.andi %690, %8 : vector<1x2x128xi1>
    %cst_146 = arith.constant 0.000000e+00 : f32
    %692 = vector.broadcast %cst_146 : f32 to vector<1x2x128xf32>
    %693 = arith.select %691, %333, %692 : vector<1x2x128xi1>, vector<1x2x128xf32>
    %694 = vector.shape_cast %693 : vector<1x2x128xf32> to vector<1x1x2x128xf32>
    %cst_147 = arith.constant dense<0.000000e+00> : vector<1xf32>
    %695 = vector.multi_reduction <add>, %694, %cst_147 [1, 2, 3] : vector<1x1x2x128xf32> to vector<1xf32>
    %696 = vector.shape_cast %695 : vector<1xf32> to vector<1x1x1x1xf32>
    %697 = vector.extract %696[0, 0, 0, 0] : f32 from vector<1x1x1x1xf32>
    %c0_148 = arith.constant 0 : index
    %c0_149 = arith.constant 0 : index
    %c0_150 = arith.constant 0 : index
    %c0_151 = arith.constant 0 : index
    %698 = vector.load %arg1[%c0_148, %c0_149, %c0_150, %c0_151] : memref<1x4x2x128xbf16, #tpu.memory_space<vmem>>, vector<1x4x2x128xbf16>
    %699 = arith.extf %698 : vector<1x4x2x128xbf16> to vector<1x4x2x128xf32>
    %c0_152 = arith.constant 0 : index
    %c0_153 = arith.constant 0 : index
    %c0_154 = arith.constant 0 : index
    %c0_155 = arith.constant 0 : index
    %700 = vector.load %arg2[%c0_152, %c0_153, %c0_154, %c0_155] : memref<1x4x2x128xbf16, #tpu.memory_space<vmem>>, vector<1x4x2x128xbf16>
    %701 = arith.extf %700 : vector<1x4x2x128xbf16> to vector<1x4x2x128xf32>
    %702 = arith.subf %699, %701 : vector<1x4x2x128xf32>
    %703 = math.absf %702 : vector<1x4x2x128xf32>
    %cst_156 = arith.constant 1.000000e+00 : f32
    %704 = vector.broadcast %cst_156 : f32 to vector<1x4x2x128xf32>
    %705 = arith.cmpf olt, %703, %704 : vector<1x4x2x128xf32>
    %cst_157 = arith.constant 5.000000e-01 : f32
    %706 = vector.broadcast %cst_157 : f32 to vector<1x4x2x128xf32>
    %707 = arith.mulf %706, %703 : vector<1x4x2x128xf32>
    %708 = arith.mulf %707, %703 : vector<1x4x2x128xf32>
    %cst_158 = arith.constant 5.000000e-01 : f32
    %709 = vector.broadcast %cst_158 : f32 to vector<1x4x2x128xf32>
    %710 = arith.subf %703, %709 : vector<1x4x2x128xf32>
    %711 = arith.select %705, %708, %710 : vector<1x4x2x128xi1>, vector<1x4x2x128xf32>
    %712 = vector.shape_cast %10 : vector<1x2x128xi1> to vector<1x1x2x128xi1>
    %cst_159 = arith.constant 0.000000e+00 : f32
    %713 = vector.shape_cast %712 : vector<1x1x2x128xi1> to vector<1x1x2x128xi1>
    %714 = vector.broadcast %713 : vector<1x1x2x128xi1> to vector<1x4x2x128xi1>
    %715 = vector.broadcast %cst_159 : f32 to vector<1x4x2x128xf32>
    %716 = arith.select %714, %711, %715 : vector<1x4x2x128xi1>, vector<1x4x2x128xf32>
    %717 = vector.shape_cast %716 : vector<1x4x2x128xf32> to vector<1x1x4x2x128xf32>
    %cst_160 = arith.constant dense<0.000000e+00> : vector<1xf32>
    %718 = vector.multi_reduction <add>, %717, %cst_160 [1, 2, 3, 4] : vector<1x1x4x2x128xf32> to vector<1xf32>
    %719 = vector.shape_cast %718 : vector<1xf32> to vector<1x1x1x1x1xf32>
    %720 = vector.extract %719[0, 0, 0, 0, 0] : f32 from vector<1x1x1x1x1xf32>
    %721 = vector.shape_cast %14 : vector<1x1x1xf32> to vector<1x1x1x1xf32>
    %cst_161 = arith.constant dense<0.000000e+00> : vector<1xf32>
    %722 = vector.multi_reduction <add>, %721, %cst_161 [1, 2, 3] : vector<1x1x1x1xf32> to vector<1xf32>
    %723 = vector.shape_cast %722 : vector<1xf32> to vector<1x1x1x1xf32>
    %724 = vector.extract %723[0, 0, 0, 0] : f32 from vector<1x1x1x1xf32>
    %725 = tpu.iota {dimensions = array<i32: 1>} : vector<1x8x128xi32>
    %c0_i32_162 = arith.constant 0 : i32
    %726 = vector.broadcast %c0_i32_162 : i32 to vector<1x8x128xi32>
    %727 = arith.cmpi eq, %725, %726 : vector<1x8x128xi32>
    %c1_i32_163 = arith.constant 1 : i32
    %728 = vector.broadcast %c1_i32_163 : i32 to vector<1x8x128xi32>
    %729 = arith.cmpi eq, %725, %728 : vector<1x8x128xi32>
    %c2_i32_164 = arith.constant 2 : i32
    %730 = vector.broadcast %c2_i32_164 : i32 to vector<1x8x128xi32>
    %731 = arith.cmpi eq, %725, %730 : vector<1x8x128xi32>
    %cst_165 = arith.constant 0.000000e+00 : f32
    %732 = vector.broadcast %724 : f32 to vector<1x8x128xf32>
    %733 = vector.broadcast %cst_165 : f32 to vector<1x8x128xf32>
    %734 = arith.select %731, %732, %733 : vector<1x8x128xi1>, vector<1x8x128xf32>
    %735 = vector.broadcast %697 : f32 to vector<1x8x128xf32>
    %736 = arith.select %729, %735, %734 : vector<1x8x128xi1>, vector<1x8x128xf32>
    %737 = vector.broadcast %720 : f32 to vector<1x8x128xf32>
    %738 = arith.select %727, %737, %736 : vector<1x8x128xi1>, vector<1x8x128xf32>
    %c0_166 = arith.constant 0 : index
    %c0_167 = arith.constant 0 : index
    %c0_168 = arith.constant 0 : index
    %739 = vector.load %arg5[%c0_166, %c0_167, %c0_168] : memref<1x8x128xf32, #tpu.memory_space<vmem>>, vector<1x8x128xf32>
    tpu.vector_store %arg5[%c0_166, %c0_167, %c0_168], %738 {strides = array<i32>} : memref<1x8x128xf32, #tpu.memory_space<vmem>>, vector<1x8x128xf32>,
    return
  }
  func.func @transform_0(%arg0: i32) -> (i32, i32, i32, i32) {
    %c0_i32 = arith.constant 0 : i32
    %c0_i32_0 = arith.constant 0 : i32
    %c0_i32_1 = arith.constant 0 : i32
    %c0_i32_2 = arith.constant 0 : i32
    return %arg0, %c0_i32, %c0_i32_0, %c0_i32_1 : i32, i32, i32, i32
  }
  func.func @transform_1(%arg0: i32) -> (i32, i32, i32, i32) {
    %c0_i32 = arith.constant 0 : i32
    %c0_i32_0 = arith.constant 0 : i32
    %c0_i32_1 = arith.constant 0 : i32
    %c0_i32_2 = arith.constant 0 : i32
    return %arg0, %c0_i32, %c0_i32_0, %c0_i32_1 : i32, i32, i32, i32
  }
  func.func @transform_2(%arg0: i32) -> (i32, i32, i32, i32) {
    %c0_i32 = arith.constant 0 : i32
    %c0_i32_0 = arith.constant 0 : i32
    %c0_i32_1 = arith.constant 0 : i32
    %c0_i32_2 = arith.constant 0 : i32
    return %arg0, %c0_i32, %c0_i32_0, %c0_i32_1 : i32, i32, i32, i32
  }
  func.func @transform_3(%arg0: i32) -> (i32, i32, i32) {
    %c0_i32 = arith.constant 0 : i32
    %c0_i32_0 = arith.constant 0 : i32
    %c0_i32_1 = arith.constant 0 : i32
    return %arg0, %c0_i32, %c0_i32_0 : i32, i32, i32
  }
  func.func @transform_4(%arg0: i32) -> (i32, i32, i32) {
    %c0_i32 = arith.constant 0 : i32
    %c0_i32_0 = arith.constant 0 : i32
    %c0_i32_1 = arith.constant 0 : i32
    return %arg0, %c0_i32, %c0_i32_0 : i32, i32, i32
  }
}

</mosaic_0001>

<bundles_post_ra>
// kernel: tpu_custom_call.1
= control target key start
LH: loop header
LB: loop body
LE: loop exit
PB: predicated region body
PF: predicated region fallthrough
CT: control target
= control target key end

     0   :  { %s2196_s0 = inlined_call_operand.hbm [shape: bf16[2,4,2,128], index: 0, kind: input, shape index: {}]   ;;  %s2197_s1 = inlined_call_operand.hbm [shape: bf16[2,4,2,128], index: 1, kind: input, shape index: {}]   ;;  %s2198_s2 = inlined_call_operand.hbm [shape: bf16[2,21,2,128], index: 2, kind: input, shape index: {}]   ;;  %s2199_s3 = inlined_call_operand.vmem [shape: s32[2,2,128], index: 3, kind: input, shape index: {}]   ;;  %s2200_s4 = inlined_call_operand.hbm [shape: f32[2,8,128], index: 4, kind: output, shape index: {}]  }
   0x1   :  { %2207 = sst [smem:[#allocation12_spill]] %s2196_s0 }
   0x2   :  { %2208 = sst [smem:[#allocation13_spill]] %s2197_s1 }
   0x3   :  { %9 = vsyncpa [#allocation3], 0 }
   0x4   :  { %11 = vsyncpa [#allocation3 + $0x1], 0 }
   0x5   :  { %12 = vsyncpa [#allocation6], 0 }
   0x6   :  { %14 = vsyncpa [#allocation6 + $0x1], 0 }
   0x7   :  { %15 = vsyncpa [#allocation4], 0 }
   0x8   :  { %17 = vsyncpa [#allocation4 + $0x1], 0  ;;  %s1541_s15 = smov 0   ;;  %s1543_s16 = smov 0  }
   0x9   :  { %s1545_s17 = smov 0   ;;  %s1547_s18 = smov 0  }
   0xa LB: > { %s1562_s19 = sadd.s32 4294967295, %s1505_s18   ;;  %s1205_s20 = sadd.s32 4294967294, %s1505_s18   ;;  %s1505_s18 = sphi %s1547_s18, %s2230_s18   ;;  %s1501_s17 = sphi %s1545_s17, %s2229_s17   ;;  %s1497_s16 = sphi %s1543_s16, %s2228_s16   ;;  %s1493_s15 = sphi %s1541_s15, %s2227_s15  }
   0xb   : > { %s1566_s21 = sadd.s32 1, %s1505_s18   ;;  %s30_s22 = sadd.s32 1, %s1501_s17 }
   0xc   : > { %s27_s23 = ssub.s32 %s1505_s18, %s1566_s21  ;;  %p37_p0 = scmp.ne.s32.totalorder %s1501_s17, %s1497_s16 }
   0xd   : > { %p28_p1 = scmp.eq.s32.totalorder %s27_s23, 0  ;;  %p38_p2 = scmp.eq.s32.totalorder %s1505_s18, 0 }
   0xe   : > { %p43_p3 = scmp.ne.s32.totalorder %s1497_s16, %s1493_s15  ;;  %p44_p4 = scmp.eq.s32.totalorder %s1562_s19, 0 }
   0xf   : > { %s1578_s24 = scalar_select %p28_p1, %s1501_s17, %s30_s22  }
  0x10   : > { %p39_p5 = por %p38_p2, %p37_p0  ;;  %p1580_p6 = por %p44_p4, %p43_p3 }
  0x11   : > { %p145_p7 = scmp.eq.s32.totalorder %s1562_s19, 1  ;;  %p151_p8 = scmp.eq.s32.totalorder %s1205_s20, 1 }
  0x12   : > { %s2209_s25 = scalar_select %p1580_p6, 1, 0 }
  0x13   : > { %p1262_p10 = scmp.lt.s32.totalorder %s1505_s18, 2  ;;  %p1587_p11 = por %p145_p7, %p37_p0 }
  0x14   : > { %p1591_p12 = por %p151_p8, %p43_p3  ;;  %s1596_s28 = sand.u32 1, %s1501_s17  }
  0x15   : > { %s2210_s26 = scalar_select %p1587_p11, 1, 0 }
  0x16   : > { %s2211_s27 = scalar_select %p1591_p12, 1, 0 }
  0x17   : > { %s1229_s29 = sshll.u32 %s1505_s18, 6  ;;  %s1208_s30 = sshll.u32 %s1596_s28, 2 }
  0x18   : > { %p1600_p13 = pnand %p1262_p10, %p39_p5  ;;  %s192_s6 = sand.u32 1, %s1505_s18  }
  0x19   : > { %s2213_s1 = sld [smem:[#allocation13_spill]]  ;;  %s196_s10 = scalar_lea.vmem [#allocation5], %s1208_s30 }
  0x1a   : > { %s203_s11 = sshll.u32 %s196_s10, 4  ;;  %s1617_s12 = scalar_lea.sflag [#allocation6], %s192_s6  ;;  %s1614_s11 = int_to_ptr.vmem [resolvable:$true] %s203_s11 }
  0x1b   : > { %p1623_p2 = pneg %p1600_p13 }
  0x1f   : > { %s1610_s9 = scalar_lea.hbm %s2213_s1, %s1229_s29  ;;  %s1350_s23 = scalar_lea.hbm %s2213_s1, 128 }
  0x20   : > { %s1345_s13 = scalar_lea.hbm %s1610_s9, 64  ;;  %p1351_p5 = scmp.lt.u32.totalorder %s1610_s9, %s2213_s1 }
  0x21   : > { %p1346_p1 = scmp.ne.s32.totalorder %s1610_s9, %s1345_s13  ;;  %p1352_p7 = scmp.lt.u32.totalorder %s1350_s23, %s1345_s13 }
  0x22   : > { %p1354_p10 = scmp.lt.u32.totalorder %s1345_s13, %s1610_s9 }
  0x23   : > { %p1348_p3 = pnand %p1623_p2, %p1346_p1  ;;  %p1353_p8 = por %p1352_p7, %p1351_p5 }
  0x25   : > { %p1349_p4 = pneg %p1348_p3  ;;  %p1355_p9 = por %p1354_p10, %p1353_p8 }
  0x27   : > { %p1356_p0 = pnand %p1355_p9, %p1349_p4 }
  0x29   : > { %1359 = shalt.err (!%p1356_p0)
}
  0x2a   : > { %s1360_s6 = scalar_lea.vmem %s1614_s11, 64  ;;  %s1507_s10 = smov [#allocation5]  }
  0x2b   : > { %p1361_p1 = scmp.ne.s32.totalorder %s1614_s11, %s1360_s6  ;;  %s1365_s20 = sshll.u32 %s1507_s10, 4  ;;  %s1366_s20 = int_to_ptr.vmem [resolvable:$false] %s1365_s20 }
  0x2c   : > { %s1367_s22 = scalar_lea.vmem %s1366_s20, 128  ;;  %p1368_p11 = scmp.lt.s32.totalorder %s1614_s11, %s1366_s20 }
  0x2d   : > { %p1363_p3 = pnand %p1361_p1, %p1623_p2  ;;  %p1369_p6 = scmp.lt.s32.totalorder %s1367_s22, %s1360_s6 }
  0x2f   : > { %p1364_p12 = pneg %p1363_p3  ;;  %p1370_p5 = por %p1369_p6, %p1368_p11 }
  0x31   : > { %p1371_p7 = pnand %p1370_p5, %p1364_p12 }
  0x33   : > { %1374 = shalt.err (!%p1371_p7)
}
  0x34   : > { %s2203_s13 = smov 16   ;;  %s2205_s23 = smov 1  }
  0x35   : > { %1254 = dma.hbm_to_vmem [thread:$0]  (!%p1600_p13), %s1610_s9, 64, %s1614_s11, %s1617_s12, %s2203_s13, %s2203_s13, %s2205_s23  }
  0x36   : > { %p239_p6 = scmp.lt.s32.totalorder %s1505_s18, 3  ;;  %s2215_s0 = sld [smem:[#allocation12_spill]] }
  0x37   : > { %p2216_p9 = scmp.ge.s32.totalorder %s1505_s18, 1  ;;  %s175_s20 = scalar_lea.vmem [#allocation2], %s1208_s30 }
  0x38   : > { %s182_s22 = sshll.u32 %s175_s20, 4  ;;  %s1231_s9 = smul.u32 21, %s1596_s28  ;;  %s1666_s22 = int_to_ptr.vmem [resolvable:$true] %s182_s22 }
  0x39   : > { %p1660_p11 = pnand %p2216_p9, %p239_p6  ;;  %s172_s11 = scalar_lea.sflag [#allocation3], %s1596_s28 }
  0x3b   : > { %s2217_s10 = scalar_select %p1660_p11, 1, 0 }
  0x3c   : > { %s1656_s6 = scalar_lea.hbm %s2215_s0, %s1229_s29  ;;  %s1380_s8 = scalar_lea.hbm %s2215_s0, 128 }
  0x3d   : > { %s1375_s13 = scalar_lea.hbm %s1656_s6, 64  ;;  %p1381_p8 = scmp.lt.u32.totalorder %s1656_s6, %s2215_s0 }
  0x3e   : > { %p1376_p12 = scmp.ne.s32.totalorder %s1656_s6, %s1375_s13  ;;  %p1382_p10 = scmp.lt.u32.totalorder %s1380_s8, %s1375_s13 }
  0x3f   : > { %p1384_p3 = scmp.lt.u32.totalorder %s1375_s13, %s1656_s6 }
  0x40   : > { %p1378_p0 = pnand %p1376_p12, %p1623_p2  ;;  %p1383_p1 = por %p1382_p10, %p1381_p8 }
  0x42   : > { %p1379_p4 = pneg %p1378_p0  ;;  %p1385_p5 = por %p1384_p3, %p1383_p1 }
  0x44   : > { %p1386_p7 = pnand %p1385_p5, %p1379_p4 }
  0x46   : > { %1389 = shalt.err (!%p1386_p7)
}
  0x47   : > { %s1390_s30 = scalar_lea.vmem %s1666_s22, 64  ;;  %s1510_s20 = smov [#allocation2]  }
  0x48   : > { %p1391_p6 = scmp.ne.s32.totalorder %s1666_s22, %s1390_s30  ;;  %s1395_s29 = sshll.u32 %s1510_s20, 4  ;;  %s1396_s29 = int_to_ptr.vmem [resolvable:$false] %s1395_s29 }
  0x49   : > { %s1397_s1 = scalar_lea.vmem %s1396_s29, 128  ;;  %p1398_p0 = scmp.lt.s32.totalorder %s1666_s22, %s1396_s29 }
  0x4a   : > { %p1393_p9 = pnand %p1391_p6, %p1623_p2  ;;  %p1399_p11 = scmp.lt.s32.totalorder %s1397_s1, %s1390_s30 }
  0x4c   : > { %p1394_p12 = pneg %p1393_p9  ;;  %p1400_p8 = por %p1399_p11, %p1398_p0 }
  0x4e   : > { %p1401_p10 = pnand %p1400_p8, %p1394_p12 }
  0x50   : > { %1404 = shalt.err (!%p1401_p10)
}
  0x51   : > { %s2218_s13 = smov 1   ;;  %s2219_s23 = smov 16  }
  0x52   : > { %1251 = dma.hbm_to_vmem [thread:$0]  (!%p1600_p13), %s1656_s6, 64, %s1666_s22, %s172_s11, %s2219_s23, %s2219_s23, %s2218_s13  }
  0x53   : > { %s1232_s7 = smul.u32 336, %s1505_s18  ;;  %s217_s8 = scalar_lea.vmem [#allocation7], %s1231_s9 }
  0x54   : > { %s224_s30 = sshll.u32 %s217_s8, 4  ;;  %s1410_s22 = scalar_lea.hbm %s2198_s2, 672  ;;  %s1704_s30 = int_to_ptr.vmem [resolvable:$true] %s224_s30 }
  0x55   : > { %s1702_s1 = scalar_lea.hbm %s2198_s2, %s1232_s7 }
  0x56   : > { %s1405_s0 = scalar_lea.hbm %s1702_s1, 336  ;;  %p1411_p3 = scmp.lt.u32.totalorder %s1702_s1, %s2198_s2 }
  0x57   : > { %p1406_p11 = scmp.ne.s32.totalorder %s1702_s1, %s1405_s0  ;;  %p1412_p5 = scmp.lt.u32.totalorder %s1410_s22, %s1405_s0 }
  0x58   : > { %p1414_p6 = scmp.lt.u32.totalorder %s1405_s0, %s1702_s1 }
  0x59   : > { %p1408_p4 = pnand %p1406_p11, %p1623_p2  ;;  %p1413_p7 = por %p1412_p5, %p1411_p3 }
  0x5b   : > { %p1409_p1 = pneg %p1408_p4  ;;  %p1415_p9 = por %p1414_p6, %p1413_p7 }
  0x5d   : > { %p1416_p12 = pnand %p1415_p9, %p1409_p1 }
  0x5f   : > { %1419 = shalt.err (!%p1416_p12)
}
  0x60   : > { %s1420_s7 = scalar_lea.vmem %s1704_s30, 336  ;;  %s1511_s8 = smov [#allocation7]  }
  0x61   : > { %p1421_p0 = scmp.ne.s32.totalorder %s1704_s30, %s1420_s7  ;;  %s1425_s20 = sshll.u32 %s1511_s8, 4  ;;  %s1426_s20 = int_to_ptr.vmem [resolvable:$false] %s1425_s20 }
  0x62   : > { %s1427_s29 = scalar_lea.vmem %s1426_s20, 672  ;;  %p1428_p11 = scmp.lt.s32.totalorder %s1704_s30, %s1426_s20 }
  0x63   : > { %p1423_p8 = pnand %p1421_p0, %p1623_p2  ;;  %p1429_p4 = scmp.lt.s32.totalorder %s1427_s29, %s1420_s7 }
  0x65   : > { %p1424_p10 = pneg %p1423_p8  ;;  %p1430_p3 = por %p1429_p4, %p1428_p11 }
  0x67   : > { %p1431_p5 = pnand %p1430_p3, %p1424_p10 }
  0x69   : > { %1434 = shalt.err (!%p1431_p5)
}
  0x6a   : > { %1257 = dma.hbm_to_vmem [thread:$0]  (!%p1600_p13), %s1702_s1, 336, %s1704_s30, %s1617_s12, %s2219_s23, %s2219_s23, %s2218_s13  }
  0x6b   : > { %p2220_p2 = scmp.ne.s32.totalorder %s2217_s10, 0 }
  0x6c   : > { %s1734_s0 = sand.u32 (!%p2220_p2), 1, %s1497_s16   ;;  %p2221_p1 = scmp.ne.s32.totalorder (!%p2220_p2), %s2209_s25, 0 }
  0x6d   : > { %243 = sbr.rel (%p2220_p2) target bundleno = 5144 (0x1418), region = 36  ;;  %s1216_s14 = sshll.u32 (!%p2220_p2), %s1734_s0, 2 }
  0x6e   : > { %s246_s6 = scalar_lea.sflag (!%p2220_p2), [#allocation3], %s1734_s0  ;;  %s1738_s28 = scalar_lea.vmem (!%p2220_p2), [#allocation2], %s1216_s14 }
  0x74   : > { %1480 = dma.done.wait (%p2221_p1), %s246_s6, 64  }
  0x75   : > { %1482 = vsyncadd (%p2221_p1), %s246_s6, 4294967232  ;;  %s254_s5 = sand.u32 1, %s1562_s19   ;;  %s1745_s10 = scalar_lea.vmem [#allocation5], %s1216_s14 }
  0x76   : > { %s255_s12 = scalar_lea.sflag [#allocation6], %s254_s5 }
  0x77   : > { %1484 = dma.done.wait (%p2221_p1), %s255_s12, 400  }
  0x78   : > { %1486 = vsyncadd (%p2221_p1), %s255_s12, 4294966896  ;;  %s1233_s13 = smul.u32 21, %s1734_s0  ;;  %p306_p13 = scmp.lt.s32.totalorder %s1562_s19, 1  ;;  %vm342_vm0 = vcmask 1041408   ;;  %v1512_v43 = vmov 0.0  }
  0x79   : > { %s1218_s11 = sshll.u32 %s1734_s0, 3  ;;  %s1226_s20 = sshll.u32 %s1562_s19, 7 }
  0x7a   : > { %s307_s23 = scalar_select %p306_p13, %s1562_s19, 1 }
  0x7b   : > { %s1754_s1 = scalar_lea.vmem [#allocation7], %s1233_s13  ;;  %s305_s14 = scalar_lea.vmem [#allocation8], %s1218_s11 }
  0x7c   : > { %s1219_s30 = sshll.u32 %s307_s23, 1  ;;  %v311_v0 = vld [vmem:[%s1754_s1] sm:$0x1]  ;;  %v312_v1 = vld [vmem:[%s1754_s1 + $0x1] sm:$0x1]  ;;  %s1080_s6 = sshll.u32 %s305_s14, 4  ;;  %s2154_s6 = int_to_ptr.vmem [resolvable:$true] %s1080_s6 }
  0x7d   : > { %s309_s9 = scalar_lea.vmem %s2199_s3, %s1219_s30  ;;  %v313_v2 = vld [vmem:[%s1754_s1 + $0x2] sm:$0x1]  ;;  %v314_v3 = vld [vmem:[%s1754_s1 + $0x3] sm:$0x1]  ;;  %v315_v4 = vld [vmem:[%s1754_s1 + $0x4] sm:$0x1]  ;;  %v1764_v5 = vunpack.c.l.bf16 %v311_v0  ;;  %v1766_v6 = vunpack.c.l.bf16 %v312_v1  ;;  %s2152_s12 = scalar_lea.hbm %s2200_s4, %s1226_s20 }
  0x7e   : > { %v316_v7 = vld [vmem:[%s1754_s1 + $0x5] sm:$0x1]  ;;  %v317_v8 = vld [vmem:[%s1754_s1 + $0x6] sm:$0x1]  ;;  %v318_v9 = vld [vmem:[%s1754_s1 + $0x7] sm:$0x1]  ;;  %v1771_v10 = vunpack.c.l.bf16 %v313_v2  ;;  %v1778_v15 = vunpack.c.l.bf16 %v314_v3  ;;  %v1780_v16 = vunpack.c.l.bf16 %v315_v4 }
  0x7f   : > { %v319_v11 = vld [vmem:[%s1754_s1 + $0x8] sm:$0x1]  ;;  %v320_v12 = vld [vmem:[%s1754_s1 + $0x9] sm:$0x1]  ;;  %v321_v13 = vld [vmem:[%s1754_s1 + $0xa] sm:$0x1]  ;;  %v354_v14 = vmax.f32 %v1764_v5, %v1766_v6  ;;  %v1787_v21 = vunpack.c.l.bf16 %v316_v7  ;;  %v1789_v22 = vunpack.c.l.bf16 %v317_v8  ;;  %v1791_v23 = vunpack.c.l.bf16 %v318_v9 }
  0x80   : > { %v1782_v17 = vld [vmem:[%s309_s9] sm:$0x3]  ;;  %v322_v18 = vld [vmem:[%s1754_s1 + $0xb] sm:$0x1]  ;;  %v323_v19 = vld [vmem:[%s1754_s1 + $0xc] sm:$0x1]  ;;  %v1793_v24 = vunpack.c.l.bf16 %v319_v11  ;;  %v1799_v29 = vunpack.c.l.bf16 %v320_v12  ;;  %v1801_v30 = vunpack.c.l.bf16 %v321_v13 }
  0x81   : > { %v324_v20 = vld [vmem:[%s1754_s1 + $0xd] sm:$0x1]  ;;  %v325_v25 = vld [vmem:[%s1754_s1 + $0xe] sm:$0x1]  ;;  %v326_v26 = vld [vmem:[%s1754_s1 + $0xf] sm:$0x1]  ;;  %v356_v28 = vmax.f32 %v354_v14, %v1771_v10  ;;  %v1803_v31 = vunpack.c.l.bf16 %v322_v18  ;;  %v1808_v35 = vunpack.c.l.bf16 %v323_v19 }
  0x82   : > { %v327_v27 = vld [vmem:[%s1754_s1 + $0x10] sm:$0x1]  ;;  %v328_v32 = vld [vmem:[%s1754_s1 + $0x11] sm:$0x1]  ;;  %v329_v33 = vld [vmem:[%s1754_s1 + $0x12] sm:$0x1]  ;;  %v1810_v36 = vunpack.c.l.bf16 %v324_v20  ;;  %v1812_v37 = vunpack.c.l.bf16 %v325_v25  ;;  %v1814_v38 = vunpack.c.l.bf16 %v326_v26 }
  0x83   : > { %v330_v34 = vld [vmem:[%s1754_s1 + $0x13] sm:$0x1]  ;;  %v331_v39 = vld [vmem:[%s1754_s1 + $0x14] sm:$0x1]  ;;  %vm339_vm1 = vcmp.gt.s32.totalorder %v1782_v17, 0  ;;  %v358_v40 = vmax.f32 %v356_v28, %v1778_v15  ;;  %v1819_v41 = vunpack.c.l.bf16 %v327_v27  ;;  %v1821_v42 = vunpack.c.l.bf16 %v328_v32  ;;  %s1067_s19 = scalar_lea.sflag [#allocation4], %s1734_s0 }
  0x84   : > { %v1220_v44 = vsel %vm339_vm1, 1.0, %v1512_v43  ;;  %v1826_v45 = vunpack.c.l.bf16 %v329_v33  ;;  %v1828_v46 = vunpack.c.l.bf16 %v330_v34  ;;  %v1830_v47 = vunpack.c.l.bf16 %v331_v39  ;;  %p2224_p6 = scmp.ne.s32.totalorder %s2210_s26, 0  ;;  %s1515_s13 = smov [#allocation8]  }
  0x85   : > { %v343_v48 = vsel %vm342_vm0, %v1220_v44, 0.0  ;;  %v360_v49 = vmax.f32 %v358_v40, %v1780_v16  ;;  %vm397_vm2 = vcmp.eq.s32.totalorder %v1782_v17, 0  ;;  %vm404_vm3 = vcmp.eq.s32.totalorder %v1782_v17, 1  ;;  %s1439_s23 = sshll.u32 %s1515_s13, 4  ;;  %s1440_s23 = int_to_ptr.vmem [resolvable:$false] %s1439_s23 }
  0x86   : > { %v398_v50 = vsel %vm397_vm2, %v1764_v5, 0.0  ;;  %v405_v51 = vsel %vm404_vm3, %v1766_v6, 0.0  ;;  %vm411_vm4 = vcmp.eq.s32.totalorder %v1782_v17, 2  ;;  %vm418_vm5 = vcmp.eq.s32.totalorder %v1782_v17, 3  ;;  %344 = vadd.xlane.f32.xlu0 %v343_v48  ;;  %s1441_s30 = scalar_lea.vmem %s1440_s23, 256  ;;  %p1442_p0 = scmp.lt.s32.totalorder %s2154_s6, %s1440_s23 }
  0x87   : > { %v362_v52 = vmax.f32 %v360_v49, %v1787_v21  ;;  %v406_v53 = vadd.f32 %v405_v51, %v398_v50  ;;  %v412_v54 = vsel %vm411_vm4, %v1771_v10, 0.0  ;;  %v419_v55 = vsel %vm418_vm5, %v1778_v15, 0.0 }
  0x88   : > { %vm425_vm6 = vcmp.eq.s32.totalorder %v1782_v17, 4  ;;  %vm432_vm7 = vcmp.eq.s32.totalorder %v1782_v17, 5  ;;  %vm439_vm8 = vcmp.eq.s32.totalorder %v1782_v17, 6  ;;  %vm446_vm9 = vcmp.eq.s32.totalorder %v1782_v17, 7 }
  0x89   : > { %v364_v56 = vmax.f32 %v362_v52, %v1789_v22  ;;  %v413_v57 = vadd.f32 %v412_v54, %v406_v53  ;;  %v426_v58 = vsel %vm425_vm6, %v1780_v16, 0.0  ;;  %v433_v59 = vsel %vm432_vm7, %v1787_v21, 0.0 }
  0x8a   : > { %v440_v60 = vsel %vm439_vm8, %v1789_v22, 0.0  ;;  %v447_v61 = vsel %vm446_vm9, %v1791_v23, 0.0  ;;  %vm453_vm10 = vcmp.eq.s32.totalorder %v1782_v17, 8  ;;  %vm460_vm11 = vcmp.eq.s32.totalorder %v1782_v17, 9 }
  0x8b   : > { %v366_v62 = vmax.f32 %v364_v56, %v1791_v23  ;;  %v420_v63 = vadd.f32 %v419_v55, %v413_v57  ;;  %v454_v0 = vsel %vm453_vm10, %v1793_v24, 0.0  ;;  %v461_v1 = vsel %vm460_vm11, %v1799_v29, 0.0 }
  0x8c   : > { %vm467_vm12 = vcmp.eq.s32.totalorder %v1782_v17, 10  ;;  %vm474_vm13 = vcmp.eq.s32.totalorder %v1782_v17, 11  ;;  %vm481_vm14 = vcmp.eq.s32.totalorder %v1782_v17, 12  ;;  %vm488_vm15 = vcmp.eq.s32.totalorder %v1782_v17, 13 }
  0x8d   : > { %v368_v2 = vmax.f32 %v366_v62, %v1793_v24  ;;  %v427_v3 = vadd.f32 %v426_v58, %v420_v63  ;;  %v468_v4 = vsel %vm467_vm12, %v1801_v30, 0.0  ;;  %v475_v7 = vsel %vm474_vm13, %v1803_v31, 0.0 }
  0x8e   : > { %v482_v8 = vsel %vm481_vm14, %v1808_v35, 0.0  ;;  %v489_v9 = vsel %vm488_vm15, %v1810_v36, 0.0  ;;  %vm495_vm2 = vcmp.eq.s32.totalorder %v1782_v17, 14  ;;  %vm502_vm3 = vcmp.eq.s32.totalorder %v1782_v17, 15 }
  0x8f   : > { %v370_v11 = vmax.f32 %v368_v2, %v1799_v29  ;;  %v434_v12 = vadd.f32 %v433_v59, %v427_v3  ;;  %v496_v13 = vsel %vm495_vm2, %v1812_v37, 0.0  ;;  %v503_v14 = vsel %vm502_vm3, %v1814_v38, 0.0 }
  0x90   : > { %vm509_vm4 = vcmp.eq.s32.totalorder %v1782_v17, 16  ;;  %vm516_vm5 = vcmp.eq.s32.totalorder %v1782_v17, 17  ;;  %vm523_vm6 = vcmp.eq.s32.totalorder %v1782_v17, 18  ;;  %vm530_vm7 = vcmp.eq.s32.totalorder %v1782_v17, 19 }
  0x91   : > { %v372_v18 = vmax.f32 %v370_v11, %v1801_v30  ;;  %v441_v19 = vadd.f32 %v440_v60, %v434_v12  ;;  %v510_v20 = vsel %vm509_vm4, %v1819_v41, 0.0  ;;  %v517_v25 = vsel %vm516_vm5, %v1821_v42, 0.0 }
  0x92   : > { %v524_v26 = vsel %vm523_vm6, %v1826_v45, 0.0  ;;  %v531_v27 = vsel %vm530_vm7, %v1828_v46, 0.0  ;;  %vm537_vm8 = vcmp.eq.s32.totalorder %v1782_v17, 20  ;;  %vm1513_vm10 = vmmov 1  }
  0x93   : > { %v374_v28 = vmax.f32 %v372_v18, %v1803_v31  ;;  %v448_v32 = vadd.f32 %v447_v61, %v441_v19  ;;  %v538_v33 = vsel %vm537_vm8, %v1830_v47, 0.0 }
  0x95   : > { %v376_v34 = vmax.f32 %v374_v28, %v1808_v35  ;;  %v455_v39 = vadd.f32 %v454_v0, %v448_v32 }
  0x97   : > { %v378_v40 = vmax.f32 %v376_v34, %v1810_v36  ;;  %v462_v44 = vadd.f32 %v461_v1, %v455_v39 }
  0x99   : > { %v380_v48 = vmax.f32 %v378_v40, %v1812_v37  ;;  %v469_v49 = vadd.f32 %v468_v4, %v462_v44 }
  0x9b   : > { %v382_v50 = vmax.f32 %v380_v48, %v1814_v38  ;;  %v476_v51 = vadd.f32 %v475_v7, %v469_v49 }
  0x9d   : > { %v384_v52 = vmax.f32 %v382_v50, %v1819_v41  ;;  %v483_v53 = vadd.f32 %v482_v8, %v476_v51 }
  0x9f   : > { %v386_v54 = vmax.f32 %v384_v52, %v1821_v42  ;;  %v490_v55 = vadd.f32 %v489_v9, %v483_v53 }
  0xa1   : > { %v388_v56 = vmax.f32 %v386_v54, %v1826_v45  ;;  %v497_v57 = vadd.f32 %v496_v13, %v490_v55 }
  0xa3   : > { %v390_v58 = vmax.f32 %v388_v56, %v1828_v46  ;;  %v504_v59 = vadd.f32 %v503_v14, %v497_v57 }
  0xa5   : > { %v1892_v60 = vmax.f32 %v390_v58, %v1830_v47  ;;  %v511_v61 = vadd.f32 %v510_v20, %v504_v59 }
  0xa7   : > { %v393_v62 = vsub.f32 %v1764_v5, %v1892_v60  ;;  %v400_v63 = vsub.f32 %v1766_v6, %v1892_v60  ;;  %v407_v0 = vsub.f32 %v1771_v10, %v1892_v60  ;;  %v414_v1 = vsub.f32 %v1778_v15, %v1892_v60 }
  0xa8   : > { %v421_v2 = vsub.f32 %v1780_v16, %v1892_v60  ;;  %v428_v9 = vsub.f32 %v1787_v21, %v1892_v60  ;;  %v435_v6 = vsub.f32 %v1789_v22, %v1892_v60  ;;  %v442_v15 = vsub.f32 %v1791_v23, %v1892_v60 }
  0xa9   : > { %v394_v3 = vmul.f32 1.442695, %v393_v62  ;;  %v401_v4 = vmul.f32 1.442695, %v400_v63  ;;  %v408_v7 = vmul.f32 1.442695, %v407_v0  ;;  %v449_v11 = vsub.f32 %v1793_v24, %v1892_v60 }
  0xaa   : > { %v415_v8 = vmul.f32 1.442695, %v414_v1  ;;  %v422_v5 = vmul.f32 1.442695, %v421_v2  ;;  %v429_v10 = vmul.f32 1.442695, %v428_v9  ;;  %v518_v12 = vadd.f32 %v517_v25, %v511_v61 }
  0xab   : > { %1301 = vpow2.f32 %v394_v3  ;;  %v436_v16 = vmul.f32 1.442695, %v435_v6  ;;  %v443_v21 = vmul.f32 1.442695, %v442_v15  ;;  %v456_v13 = vsub.f32 %v1799_v29, %v1892_v60 }
  0xac   : > { %1303 = vpow2.f32 %v401_v4  ;;  %v525_v14 = vadd.f32 %v524_v26, %v518_v12  ;;  %v450_v22 = vmul.f32 1.442695, %v449_v11  ;;  %v463_v18 = vsub.f32 %v1801_v30, %v1892_v60 }
  0xad   : > { %1305 = vpow2.f32 %v408_v7  ;;  %v457_v28 = vmul.f32 1.442695, %v456_v13  ;;  %v470_v24 = vsub.f32 %v1803_v31, %v1892_v60  ;;  %v477_v26 = vsub.f32 %v1808_v35, %v1892_v60 }
  0xae   : > { %1307 = vpow2.f32 %v415_v8  ;;  %v532_v20 = vadd.f32 %v531_v27, %v525_v14  ;;  %v464_v29 = vmul.f32 1.442695, %v463_v18  ;;  %v484_v44 = vsub.f32 %v1810_v36, %v1892_v60 }
  0xaf   : > { %1309 = vpow2.f32 %v422_v5  ;;  %v471_v27 = vmul.f32 1.442695, %v470_v24  ;;  %v478_v31 = vmul.f32 1.442695, %v477_v26  ;;  %v498_v35 = vsub.f32 %v1814_v38, %v1892_v60 }
  0xb0   : > { %1311 = vpow2.f32 %v429_v10  ;;  %v1918_v34 = vadd.f32 %v538_v33, %v532_v20  ;;  %v491_v33 = vsub.f32 %v1812_v37, %v1892_v60  ;;  %v485_v52 = vmul.f32 1.442695, %v484_v44 }
  0xb1   : > { %1313 = vpow2.f32 %v436_v16  ;;  %v505_v36 = vsub.f32 %v1819_v41, %v1892_v60  ;;  %v499_v58 = vmul.f32 1.442695, %v498_v35  ;;  %v512_v37 = vsub.f32 %v1821_v42, %v1892_v60 }
  0xb2   : > { %1315 = vpow2.f32 %v443_v21  ;;  %v492_v55 = vmul.f32 1.442695, %v491_v33  ;;  %v519_v38 = vsub.f32 %v1826_v45, %v1892_v60  ;;  %v526_v41 = vsub.f32 %v1828_v46, %v1892_v60 }
  0xb3   : > { %1317 = vpow2.f32 %v450_v22  ;;  %v506_v62 = vmul.f32 1.442695, %v505_v36  ;;  %v513_v1 = vmul.f32 1.442695, %v512_v37  ;;  %v533_v42 = vsub.f32 %v1830_v47, %v1892_v60 }
  0xb4   : > { %1319 = vpow2.f32 %v457_v28  ;;  %v520_v4 = vmul.f32 1.442695, %v519_v38  ;;  %v527_v9 = vmul.f32 1.442695, %v526_v41  ;;  %v332_v22 = vlaneseq }
  0xb5   : > { %v1302_v19 = vpop.eup %1301  ;;  %1321 = vpow2.f32 %v464_v29  ;;  %v534_v6 = vmul.f32 1.442695, %v533_v42 }
  0xb6   : > { %v1304_v23 = vpop.eup %1303  ;;  %1323 = vpow2.f32 %v471_v27  ;;  %v1938_v28 = vshrl.u32 %v332_v22, 7 }
  0xb7   : > { %v1306_v25 = vpop.eup %1305  ;;  %v403_v32 = vadd.f32 %v1304_v23, %v1302_v19  ;;  %1325 = vpow2.f32 %v478_v31 }
  0xb8   : > { %v1308_v39 = vpop.eup %1307  ;;  %1327 = vpow2.f32 %v485_v52 }
  0xb9   : > { %v410_v40 = vadd.f32 %v1306_v25, %v403_v32  ;;  %v1310_v30 = vpop.eup %1309  ;;  %1329 = vpow2.f32 %v492_v55  ;;  %v335_v32 = vand.u32 127, %v332_v22 }
  0xba   : > { %v1312_v49 = vpop.eup %1311  ;;  %1331 = vpow2.f32 %v499_v58 }
  0xbb   : > { %v417_v48 = vadd.f32 %v1308_v39, %v410_v40  ;;  %v1314_v51 = vpop.eup %1313  ;;  %1333 = vpow2.f32 %v506_v62  ;;  %v336_v39 = vmul.u32 128, %v1938_v28  ;;  %v1514_v62 = vmov 0  }
  0xbc   : > { %v1316_v54 = vpop.eup %1315  ;;  %1335 = vpow2.f32 %v513_v1 }
  0xbd   : > { %v424_v50 = vadd.f32 %v1310_v30, %v417_v48  ;;  %v1318_v57 = vpop.eup %1317  ;;  %1337 = vpow2.f32 %v520_v4  ;;  %v1941_v29 = vadd.s32 %v336_v39, %v335_v32 }
  0xbe   : > { %v1320_v61 = vpop.eup %1319  ;;  %1339 = vpow2.f32 %v527_v9 }
  0xbf   : > { %v431_v53 = vadd.f32 %v1312_v49, %v424_v50  ;;  %v1322_v0 = vpop.eup %1321  ;;  %1341 = vpow2.f32 %v534_v6  ;;  %vm338_vm9 = vcmp.lt.s32.totalorder %v1941_v29, 200 }
  0xc0   : > { %v1324_v3 = vpop.eup %1323  ;;  %vm544_vm11 = vmxor %vm338_vm9, %vm1513_vm10 }
  0xc1   : > { %v438_v56 = vadd.f32 %v1314_v51, %v431_v53  ;;  %v1326_v8 = vpop.eup %1325  ;;  %vm545_vm12 = vmor %vm339_vm1, %vm544_vm11 }
  0xc2   : > { %v1328_v45 = vpop.eup %1327 }
  0xc3   : > { %v445_v59 = vadd.f32 %v1316_v54, %v438_v56  ;;  %v1330_v15 = vpop.eup %1329 }
  0xc4   : > { %v1332_v46 = vpop.eup %1331 }
  0xc5   : > { %v452_v63 = vadd.f32 %v1318_v57, %v445_v59  ;;  %v1334_v12 = vpop.eup %1333 }
  0xc6   : > { %v1336_v13 = vpop.eup %1335 }
  0xc7   : > { %v459_v2 = vadd.f32 %v1320_v61, %v452_v63  ;;  %v1338_v47 = vpop.eup %1337 }
  0xc8   : > { %v1340_v19 = vpop.eup %1339 }
  0xc9   : > { %v466_v7 = vadd.f32 %v1322_v0, %v459_v2  ;;  %v1342_v23 = vpop.eup %1341 }
  0xcb   : > { %v473_v5 = vadd.f32 %v1324_v3, %v466_v7 }
  0xcd   : > { %v480_v10 = vadd.f32 %v1326_v8, %v473_v5 }
  0xcf   : > { %v487_v16 = vadd.f32 %v1328_v45, %v480_v10 }
  0xd1   : > { %v494_v11 = vadd.f32 %v1330_v15, %v487_v16 }
  0xd3   : > { %v501_v21 = vadd.f32 %v1332_v46, %v494_v11 }
  0xd5   : > { %v508_v14 = vadd.f32 %v1334_v12, %v501_v21 }
  0xd7   : > { %v515_v18 = vadd.f32 %v1336_v13, %v508_v14 }
  0xd9   : > { %v522_v20 = vadd.f32 %v1338_v47, %v515_v18 }
  0xdb   : > { %v529_v24 = vadd.f32 %v1340_v19, %v522_v20 }
  0xdd   : > { %v536_v25 = vadd.f32 %v1342_v23, %v529_v24 }
  0xdf   : > { %1343 = vlog2.f32 %v536_v25 }
  0xe9   : > { %v1344_v26 = vpop.eup %1343 }
  0xea   : > { %v541_v40 = vmul.f32 0.6931472, %v1344_v26 }
  0xec   : > { %v542_v30 = vadd.f32 %v541_v40, %v1892_v60 }
  0xee   : > { %v1950_v27 = vsub.f32 %v542_v30, %v1918_v34 }
  0xf0   : > { %v546_v44 = vsel %vm545_vm12, 0.0, %v1950_v27 }
  0xf1   : > { %vm547_vm13 = vcmp.gt.f32.partialorder %v546_v44, 0.0 }
  0xf2   : > { %v548_v48 = vsel %vm547_vm13, %v546_v44, 0.0 }
  0xf3   : > { %v1953_v49 = vshra.s32 %v548_v48, 11 }
  0xf5   : > { %vm553_vm14 = vcmp.ge.s32.totalorder %v1953_v49, 524288 }
  0xf6   : > { %v554_v31 = vsel %vm553_vm14, 1.0, %v1512_v43 }
  0xf7   : > { %v555_v33 = vsel %vm342_vm0, %v554_v31, 0.0 }
  0xf8   : > { %556 = vadd.xlane.f32.xlu0 %v555_v33 }
 0x113   : > { %v345_v60 = vpop.xlane.xlu0 %344 }
 0x114   : > { %v346_v50 = vrot.slane %v345_v60, 4 }
 0x116   : > { %v347_v51 = vadd.f32 %v346_v50, %v345_v60 }
 0x118   : > { %v348_v52 = vrot.slane %v347_v51, 2 }
 0x11a   : > { %v349_v35 = vadd.f32 %v348_v52, %v347_v51 }
 0x11c   : > { %v350_v34 = vrot.slane %v349_v35, 1 }
 0x11e   : > { %v1958_v55 = vadd.f32 %v350_v34, %v349_v35 }
 0x120   : > { %v551_v57 = vmul.f32 3.0, %v1958_v55 }
 0x122   : > { %v1961_v59 = vmin.f32 %v551_v57, 199.0 }
 0x185   : > { %v557_v53 = vpop.xlane.xlu0 %556 }
 0x186   : > { %v558_v54 = vrot.slane %v557_v53, 4 }
 0x188   : > { %v559_v36 = vadd.f32 %v558_v54, %v557_v53 }
 0x18a   : > { %v560_v56 = vrot.slane %v559_v36, 2 }
 0x18c   : > { %v561_v58 = vadd.f32 %v560_v56, %v559_v36 }
 0x18e   : > { %v562_v37 = vrot.slane %v561_v58, 1 }
 0x190   : > { %v563_v61 = vadd.f32 %v562_v37, %v561_v58 }
 0x192   : > { %vm564_vm15 = vcmp.ge.f32.partialorder %v563_v61, %v1961_v59 }
 0x193   : > { %v565_v38 = vsel %vm564_vm15, 524288, %v1514_v62 }
 0x194   : > { %v566_v63 = vor.u32 262144, %v565_v38 }
 0x196   : > { %vm567_vm2 = vcmp.ge.s32.totalorder %v1953_v49, %v566_v63 }
 0x197   : > { %v568_v0 = vsel %vm567_vm2, 1.0, %v1512_v43 }
 0x198   : > { %v569_v1 = vsel %vm342_vm0, %v568_v0, 0.0 }
 0x199   : > { %570 = vadd.xlane.f32.xlu1 %v569_v1 }
 0x226   : > { %v571_v41 = vpop.xlane.xlu1 %570 }
 0x227   : > { %v572_v2 = vrot.slane %v571_v41, 4 }
 0x229   : > { %v573_v3 = vadd.f32 %v572_v2, %v571_v41 }
 0x22b   : > { %v574_v4 = vrot.slane %v573_v3, 2 }
 0x22d   : > { %v575_v42 = vadd.f32 %v574_v4, %v573_v3 }
 0x22f   : > { %v576_v7 = vrot.slane %v575_v42, 1 }
 0x231   : > { %v577_v8 = vadd.f32 %v576_v7, %v575_v42 }
 0x233   : > { %vm578_vm3 = vcmp.ge.f32.partialorder %v577_v8, %v1961_v59 }
 0x234   : > { %v579_v9 = vsel %vm578_vm3, %v566_v63, %v565_v38 }
 0x235   : > { %v580_v5 = vor.u32 131072, %v579_v9 }
 0x237   : > { %vm581_vm4 = vcmp.ge.s32.totalorder %v1953_v49, %v580_v5 }
 0x238   : > { %v582_v45 = vsel %vm581_vm4, 1.0, %v1512_v43 }
 0x239   : > { %v583_v6 = vsel %vm342_vm0, %v582_v45, 0.0 }
 0x23a   : > { %584 = vadd.xlane.f32.xlu1 %v583_v6 }
 0x2c7   : > { %v585_v10 = vpop.xlane.xlu1 %584 }
 0x2c8   : > { %v586_v15 = vrot.slane %v585_v10, 4 }
 0x2ca   : > { %v587_v16 = vadd.f32 %v586_v15, %v585_v10 }
 0x2cc   : > { %v588_v46 = vrot.slane %v587_v16, 2 }
 0x2ce   : > { %v589_v11 = vadd.f32 %v588_v46, %v587_v16 }
 0x2d0   : > { %v590_v12 = vrot.slane %v589_v11, 1 }
 0x2d2   : > { %v591_v21 = vadd.f32 %v590_v12, %v589_v11 }
 0x2d4   : > { %vm592_vm5 = vcmp.ge.f32.partialorder %v591_v21, %v1961_v59 }
 0x2d5   : > { %v593_v13 = vsel %vm592_vm5, %v580_v5, %v579_v9 }
 0x2d6   : > { %v594_v14 = vor.u32 65536, %v593_v13 }
 0x2d8   : > { %vm595_vm6 = vcmp.ge.s32.totalorder %v1953_v49, %v594_v14 }
 0x2d9   : > { %v596_v47 = vsel %vm595_vm6, 1.0, %v1512_v43 }
 0x2da   : > { %v597_v22 = vsel %vm342_vm0, %v596_v47, 0.0 }
 0x2db   : > { %598 = vadd.xlane.f32.xlu0 %v597_v22 }
 0x368   : > { %v599_v18 = vpop.xlane.xlu0 %598 }
 0x369   : > { %v600_v19 = vrot.slane %v599_v18, 4 }
 0x36b   : > { %v601_v20 = vadd.f32 %v600_v19, %v599_v18 }
 0x36d   : > { %v602_v23 = vrot.slane %v601_v20, 2 }
 0x36f   : > { %v603_v24 = vadd.f32 %v602_v23, %v601_v20 }
 0x371   : > { %v604_v25 = vrot.slane %v603_v24, 1 }
 0x373   : > { %v605_v32 = vadd.f32 %v604_v25, %v603_v24 }
 0x375   : > { %vm606_vm7 = vcmp.ge.f32.partialorder %v605_v32, %v1961_v59 }
 0x376   : > { %v607_v39 = vsel %vm606_vm7, %v594_v14, %v593_v13 }
 0x377   : > { %v608_v26 = vor.u32 32768, %v607_v39 }
 0x379   : > { %vm609_vm8 = vcmp.ge.s32.totalorder %v1953_v49, %v608_v26 }
 0x37a   : > { %v610_v40 = vsel %vm609_vm8, 1.0, %v1512_v43 }
 0x37b   : > { %v611_v30 = vsel %vm342_vm0, %v610_v40, 0.0 }
 0x37c   : > { %612 = vadd.xlane.f32.xlu1 %v611_v30 }
 0x409   : > { %v613_v44 = vpop.xlane.xlu1 %612 }
 0x40a   : > { %v614_v48 = vrot.slane %v613_v44, 4 }
 0x40c   : > { %v615_v31 = vadd.f32 %v614_v48, %v613_v44 }
 0x40e   : > { %v616_v33 = vrot.slane %v615_v31, 2 }
 0x410   : > { %v617_v60 = vadd.f32 %v616_v33, %v615_v31 }
 0x412   : > { %v618_v50 = vrot.slane %v617_v60, 1 }
 0x414   : > { %v619_v51 = vadd.f32 %v618_v50, %v617_v60 }
 0x416   : > { %vm620_vm10 = vcmp.ge.f32.partialorder %v619_v51, %v1961_v59 }
 0x417   : > { %v621_v52 = vsel %vm620_vm10, %v608_v26, %v607_v39 }
 0x418   : > { %v622_v35 = vor.u32 16384, %v621_v52 }
 0x41a   : > { %vm623_vm11 = vcmp.ge.s32.totalorder %v1953_v49, %v622_v35 }
 0x41b   : > { %v624_v34 = vsel %vm623_vm11, 1.0, %v1512_v43 }
 0x41c   : > { %v625_v53 = vsel %vm342_vm0, %v624_v34, 0.0 }
 0x41d   : > { %626 = vadd.xlane.f32.xlu0 %v625_v53 }
 0x4aa   : > { %v627_v54 = vpop.xlane.xlu0 %626 }
 0x4ab   : > { %v628_v36 = vrot.slane %v627_v54, 4 }
 0x4ad   : > { %v629_v56 = vadd.f32 %v628_v36, %v627_v54 }
 0x4af   : > { %v630_v57 = vrot.slane %v629_v56, 2 }
 0x4b1   : > { %v631_v58 = vadd.f32 %v630_v57, %v629_v56 }
 0x4b3   : > { %v632_v37 = vrot.slane %v631_v58, 1 }
 0x4b5   : > { %v633_v61 = vadd.f32 %v632_v37, %v631_v58 }
 0x4b7   : > { %vm634_vm12 = vcmp.ge.f32.partialorder %v633_v61, %v1961_v59 }
 0x4b8   : > { %v635_v38 = vsel %vm634_vm12, %v622_v35, %v621_v52 }
 0x4b9   : > { %v636_v63 = vor.u32 8192, %v635_v38 }
 0x4bb   : > { %vm637_vm13 = vcmp.ge.s32.totalorder %v1953_v49, %v636_v63 }
 0x4bc   : > { %v638_v0 = vsel %vm637_vm13, 1.0, %v1512_v43 }
 0x4bd   : > { %v639_v1 = vsel %vm342_vm0, %v638_v0, 0.0 }
 0x4be   : > { %640 = vadd.xlane.f32.xlu1 %v639_v1 }
 0x54b   : > { %v641_v41 = vpop.xlane.xlu1 %640 }
 0x54c   : > { %v642_v2 = vrot.slane %v641_v41, 4 }
 0x54e   : > { %v643_v3 = vadd.f32 %v642_v2, %v641_v41 }
 0x550   : > { %v644_v4 = vrot.slane %v643_v3, 2 }
 0x552   : > { %v645_v42 = vadd.f32 %v644_v4, %v643_v3 }
 0x554   : > { %v646_v7 = vrot.slane %v645_v42, 1 }
 0x556   : > { %v647_v8 = vadd.f32 %v646_v7, %v645_v42 }
 0x558   : > { %vm648_vm14 = vcmp.ge.f32.partialorder %v647_v8, %v1961_v59 }
 0x559   : > { %v649_v9 = vsel %vm648_vm14, %v636_v63, %v635_v38 }
 0x55a   : > { %v650_v5 = vor.u32 4096, %v649_v9 }
 0x55c   : > { %vm651_vm15 = vcmp.ge.s32.totalorder %v1953_v49, %v650_v5 }
 0x55d   : > { %v652_v45 = vsel %vm651_vm15, 1.0, %v1512_v43 }
 0x55e   : > { %v653_v6 = vsel %vm342_vm0, %v652_v45, 0.0 }
 0x55f   : > { %654 = vadd.xlane.f32.xlu0 %v653_v6 }
 0x5ec   : > { %v655_v10 = vpop.xlane.xlu0 %654 }
 0x5ed   : > { %v656_v15 = vrot.slane %v655_v10, 4 }
 0x5ef   : > { %v657_v16 = vadd.f32 %v656_v15, %v655_v10 }
 0x5f1   : > { %v658_v46 = vrot.slane %v657_v16, 2 }
 0x5f3   : > { %v659_v11 = vadd.f32 %v658_v46, %v657_v16 }
 0x5f5   : > { %v660_v12 = vrot.slane %v659_v11, 1 }
 0x5f7   : > { %v661_v21 = vadd.f32 %v660_v12, %v659_v11 }
 0x5f9   : > { %vm662_vm2 = vcmp.ge.f32.partialorder %v661_v21, %v1961_v59 }
 0x5fa   : > { %v663_v13 = vsel %vm662_vm2, %v650_v5, %v649_v9 }
 0x5fb   : > { %v664_v14 = vor.u32 2048, %v663_v13 }
 0x5fd   : > { %vm665_vm3 = vcmp.ge.s32.totalorder %v1953_v49, %v664_v14 }
 0x5fe   : > { %v666_v47 = vsel %vm665_vm3, 1.0, %v1512_v43 }
 0x5ff   : > { %v667_v22 = vsel %vm342_vm0, %v666_v47, 0.0 }
 0x600   : > { %668 = vadd.xlane.f32.xlu1 %v667_v22 }
 0x68d   : > { %v669_v18 = vpop.xlane.xlu1 %668 }
 0x68e   : > { %v670_v19 = vrot.slane %v669_v18, 4 }
 0x690   : > { %v671_v20 = vadd.f32 %v670_v19, %v669_v18 }
 0x692   : > { %v672_v23 = vrot.slane %v671_v20, 2 }
 0x694   : > { %v673_v24 = vadd.f32 %v672_v23, %v671_v20 }
 0x696   : > { %v674_v25 = vrot.slane %v673_v24, 1 }
 0x698   : > { %v675_v32 = vadd.f32 %v674_v25, %v673_v24 }
 0x69a   : > { %vm676_vm4 = vcmp.ge.f32.partialorder %v675_v32, %v1961_v59 }
 0x69b   : > { %v677_v39 = vsel %vm676_vm4, %v664_v14, %v663_v13 }
 0x69c   : > { %v678_v26 = vor.u32 1024, %v677_v39 }
 0x69e   : > { %vm679_vm5 = vcmp.ge.s32.totalorder %v1953_v49, %v678_v26 }
 0x69f   : > { %v680_v40 = vsel %vm679_vm5, 1.0, %v1512_v43 }
 0x6a0   : > { %v681_v30 = vsel %vm342_vm0, %v680_v40, 0.0 }
 0x6a1   : > { %682 = vadd.xlane.f32.xlu0 %v681_v30 }
 0x72e   : > { %v683_v44 = vpop.xlane.xlu0 %682 }
 0x72f   : > { %v684_v48 = vrot.slane %v683_v44, 4 }
 0x731   : > { %v685_v31 = vadd.f32 %v684_v48, %v683_v44 }
 0x733   : > { %v686_v33 = vrot.slane %v685_v31, 2 }
 0x735   : > { %v687_v60 = vadd.f32 %v686_v33, %v685_v31 }
 0x737   : > { %v688_v50 = vrot.slane %v687_v60, 1 }
 0x739   : > { %v689_v51 = vadd.f32 %v688_v50, %v687_v60 }
 0x73b   : > { %vm690_vm6 = vcmp.ge.f32.partialorder %v689_v51, %v1961_v59 }
 0x73c   : > { %v691_v52 = vsel %vm690_vm6, %v678_v26, %v677_v39 }
 0x73d   : > { %v692_v35 = vor.u32 512, %v691_v52 }
 0x73f   : > { %vm693_vm7 = vcmp.ge.s32.totalorder %v1953_v49, %v692_v35 }
 0x740   : > { %v694_v34 = vsel %vm693_vm7, 1.0, %v1512_v43 }
 0x741   : > { %v695_v53 = vsel %vm342_vm0, %v694_v34, 0.0 }
 0x742   : > { %696 = vadd.xlane.f32.xlu1 %v695_v53 }
 0x7cf   : > { %v697_v54 = vpop.xlane.xlu1 %696 }
 0x7d0   : > { %v698_v36 = vrot.slane %v697_v54, 4 }
 0x7d2   : > { %v699_v56 = vadd.f32 %v698_v36, %v697_v54 }
 0x7d4   : > { %v700_v57 = vrot.slane %v699_v56, 2 }
 0x7d6   : > { %v701_v58 = vadd.f32 %v700_v57, %v699_v56 }
 0x7d8   : > { %v702_v37 = vrot.slane %v701_v58, 1 }
 0x7da   : > { %v703_v61 = vadd.f32 %v702_v37, %v701_v58 }
 0x7dc   : > { %vm704_vm8 = vcmp.ge.f32.partialorder %v703_v61, %v1961_v59 }
 0x7dd   : > { %v705_v38 = vsel %vm704_vm8, %v692_v35, %v691_v52 }
 0x7de   : > { %v706_v63 = vor.u32 256, %v705_v38 }
 0x7e0   : > { %vm707_vm10 = vcmp.ge.s32.totalorder %v1953_v49, %v706_v63 }
 0x7e1   : > { %v708_v0 = vsel %vm707_vm10, 1.0, %v1512_v43 }
 0x7e2   : > { %v709_v1 = vsel %vm342_vm0, %v708_v0, 0.0 }
 0x7e3   : > { %710 = vadd.xlane.f32.xlu0 %v709_v1 }
 0x870   : > { %v711_v41 = vpop.xlane.xlu0 %710 }
 0x871   : > { %v712_v2 = vrot.slane %v711_v41, 4 }
 0x873   : > { %v713_v3 = vadd.f32 %v712_v2, %v711_v41 }
 0x875   : > { %v714_v4 = vrot.slane %v713_v3, 2 }
 0x877   : > { %v715_v42 = vadd.f32 %v714_v4, %v713_v3 }
 0x879   : > { %v716_v7 = vrot.slane %v715_v42, 1 }
 0x87b   : > { %v717_v8 = vadd.f32 %v716_v7, %v715_v42 }
 0x87d   : > { %vm718_vm11 = vcmp.ge.f32.partialorder %v717_v8, %v1961_v59 }
 0x87e   : > { %v719_v9 = vsel %vm718_vm11, %v706_v63, %v705_v38 }
 0x87f   : > { %v720_v5 = vor.u32 128, %v719_v9 }
 0x881   : > { %vm721_vm12 = vcmp.ge.s32.totalorder %v1953_v49, %v720_v5 }
 0x882   : > { %v722_v45 = vsel %vm721_vm12, 1.0, %v1512_v43 }
 0x883   : > { %v723_v6 = vsel %vm342_vm0, %v722_v45, 0.0 }
 0x884   : > { %724 = vadd.xlane.f32.xlu1 %v723_v6 }
 0x911   : > { %v725_v10 = vpop.xlane.xlu1 %724 }
 0x912   : > { %v726_v15 = vrot.slane %v725_v10, 4 }
 0x914   : > { %v727_v16 = vadd.f32 %v726_v15, %v725_v10 }
 0x916   : > { %v728_v46 = vrot.slane %v727_v16, 2 }
 0x918   : > { %v729_v11 = vadd.f32 %v728_v46, %v727_v16 }
 0x91a   : > { %v730_v12 = vrot.slane %v729_v11, 1 }
 0x91c   : > { %v731_v21 = vadd.f32 %v730_v12, %v729_v11 }
 0x91e   : > { %vm732_vm13 = vcmp.ge.f32.partialorder %v731_v21, %v1961_v59 }
 0x91f   : > { %v733_v13 = vsel %vm732_vm13, %v720_v5, %v719_v9 }
 0x920   : > { %v734_v14 = vor.u32 64, %v733_v13 }
 0x922   : > { %vm735_vm14 = vcmp.ge.s32.totalorder %v1953_v49, %v734_v14 }
 0x923   : > { %v736_v47 = vsel %vm735_vm14, 1.0, %v1512_v43 }
 0x924   : > { %v737_v22 = vsel %vm342_vm0, %v736_v47, 0.0 }
 0x925   : > { %738 = vadd.xlane.f32.xlu0 %v737_v22 }
 0x9b2   : > { %v739_v18 = vpop.xlane.xlu0 %738 }
 0x9b3   : > { %v740_v19 = vrot.slane %v739_v18, 4 }
 0x9b5   : > { %v741_v20 = vadd.f32 %v740_v19, %v739_v18 }
 0x9b7   : > { %v742_v23 = vrot.slane %v741_v20, 2 }
 0x9b9   : > { %v743_v24 = vadd.f32 %v742_v23, %v741_v20 }
 0x9bb   : > { %v744_v25 = vrot.slane %v743_v24, 1 }
 0x9bd   : > { %v745_v32 = vadd.f32 %v744_v25, %v743_v24 }
 0x9bf   : > { %vm746_vm15 = vcmp.ge.f32.partialorder %v745_v32, %v1961_v59 }
 0x9c0   : > { %v747_v39 = vsel %vm746_vm15, %v734_v14, %v733_v13 }
 0x9c1   : > { %v748_v26 = vor.u32 32, %v747_v39 }
 0x9c3   : > { %vm749_vm2 = vcmp.ge.s32.totalorder %v1953_v49, %v748_v26 }
 0x9c4   : > { %v750_v40 = vsel %vm749_vm2, 1.0, %v1512_v43 }
 0x9c5   : > { %v751_v30 = vsel %vm342_vm0, %v750_v40, 0.0 }
 0x9c6   : > { %752 = vadd.xlane.f32.xlu1 %v751_v30 }
 0xa53   : > { %v753_v44 = vpop.xlane.xlu1 %752 }
 0xa54   : > { %v754_v48 = vrot.slane %v753_v44, 4 }
 0xa56   : > { %v755_v31 = vadd.f32 %v754_v48, %v753_v44 }
 0xa58   : > { %v756_v33 = vrot.slane %v755_v31, 2 }
 0xa5a   : > { %v757_v60 = vadd.f32 %v756_v33, %v755_v31 }
 0xa5c   : > { %v758_v50 = vrot.slane %v757_v60, 1 }
 0xa5e   : > { %v759_v51 = vadd.f32 %v758_v50, %v757_v60 }
 0xa60   : > { %vm760_vm3 = vcmp.ge.f32.partialorder %v759_v51, %v1961_v59 }
 0xa61   : > { %v761_v52 = vsel %vm760_vm3, %v748_v26, %v747_v39 }
 0xa62   : > { %v762_v35 = vor.u32 16, %v761_v52 }
 0xa64   : > { %vm763_vm4 = vcmp.ge.s32.totalorder %v1953_v49, %v762_v35 }
 0xa65   : > { %v764_v34 = vsel %vm763_vm4, 1.0, %v1512_v43 }
 0xa66   : > { %v765_v53 = vsel %vm342_vm0, %v764_v34, 0.0 }
 0xa67   : > { %766 = vadd.xlane.f32.xlu0 %v765_v53 }
 0xaf4   : > { %v767_v54 = vpop.xlane.xlu0 %766 }
 0xaf5   : > { %v768_v36 = vrot.slane %v767_v54, 4 }
 0xaf7   : > { %v769_v56 = vadd.f32 %v768_v36, %v767_v54 }
 0xaf9   : > { %v770_v57 = vrot.slane %v769_v56, 2 }
 0xafb   : > { %v771_v58 = vadd.f32 %v770_v57, %v769_v56 }
 0xafd   : > { %v772_v37 = vrot.slane %v771_v58, 1 }
 0xaff   : > { %v773_v61 = vadd.f32 %v772_v37, %v771_v58 }
 0xb01   : > { %vm774_vm5 = vcmp.ge.f32.partialorder %v773_v61, %v1961_v59 }
 0xb02   : > { %v775_v38 = vsel %vm774_vm5, %v762_v35, %v761_v52  ;;  %v846_v52 = vsub.s32 256, %v1941_v29 }
 0xb03   : > { %v776_v63 = vor.u32 8, %v775_v38 }
 0xb05   : > { %vm777_vm6 = vcmp.ge.s32.totalorder %v1953_v49, %v776_v63 }
 0xb06   : > { %v778_v0 = vsel %vm777_vm6, 1.0, %v1512_v43 }
 0xb07   : > { %v779_v1 = vsel %vm342_vm0, %v778_v0, 0.0 }
 0xb08   : > { %780 = vadd.xlane.f32.xlu1 %v779_v1 }
 0xb95   : > { %v781_v41 = vpop.xlane.xlu1 %780 }
 0xb96   : > { %v782_v2 = vrot.slane %v781_v41, 4 }
 0xb98   : > { %v783_v3 = vadd.f32 %v782_v2, %v781_v41 }
 0xb9a   : > { %v784_v4 = vrot.slane %v783_v3, 2 }
 0xb9c   : > { %v785_v42 = vadd.f32 %v784_v4, %v783_v3 }
 0xb9e   : > { %v786_v7 = vrot.slane %v785_v42, 1 }
 0xba0   : > { %v787_v8 = vadd.f32 %v786_v7, %v785_v42 }
 0xba2   : > { %vm788_vm7 = vcmp.ge.f32.partialorder %v787_v8, %v1961_v59 }
 0xba3   : > { %v789_v9 = vsel %vm788_vm7, %v776_v63, %v775_v38 }
 0xba4   : > { %v790_v5 = vor.u32 4, %v789_v9 }
 0xba6   : > { %vm791_vm8 = vcmp.ge.s32.totalorder %v1953_v49, %v790_v5 }
 0xba7   : > { %v792_v45 = vsel %vm791_vm8, 1.0, %v1512_v43 }
 0xba8   : > { %v793_v6 = vsel %vm342_vm0, %v792_v45, 0.0 }
 0xba9   : > { %794 = vadd.xlane.f32.xlu0 %v793_v6 }
 0xc36   : > { %v795_v10 = vpop.xlane.xlu0 %794 }
 0xc37   : > { %v796_v15 = vrot.slane %v795_v10, 4 }
 0xc39   : > { %v797_v16 = vadd.f32 %v796_v15, %v795_v10 }
 0xc3b   : > { %v798_v46 = vrot.slane %v797_v16, 2 }
 0xc3d   : > { %v799_v11 = vadd.f32 %v798_v46, %v797_v16 }
 0xc3f   : > { %v800_v12 = vrot.slane %v799_v11, 1 }
 0xc41   : > { %v801_v21 = vadd.f32 %v800_v12, %v799_v11 }
 0xc43   : > { %vm802_vm10 = vcmp.ge.f32.partialorder %v801_v21, %v1961_v59 }
 0xc44   : > { %v803_v13 = vsel %vm802_vm10, %v790_v5, %v789_v9 }
 0xc45   : > { %v804_v14 = vor.u32 2, %v803_v13 }
 0xc47   : > { %vm805_vm11 = vcmp.ge.s32.totalorder %v1953_v49, %v804_v14 }
 0xc48   : > { %v806_v47 = vsel %vm805_vm11, 1.0, %v1512_v43 }
 0xc49   : > { %v807_v22 = vsel %vm342_vm0, %v806_v47, 0.0 }
 0xc4a   : > { %808 = vadd.xlane.f32.xlu1 %v807_v22 }
 0xcd7   : > { %v809_v18 = vpop.xlane.xlu1 %808 }
 0xcd8   : > { %v810_v19 = vrot.slane %v809_v18, 4 }
 0xcda   : > { %v811_v20 = vadd.f32 %v810_v19, %v809_v18 }
 0xcdc   : > { %v812_v23 = vrot.slane %v811_v20, 2 }
 0xcde   : > { %v813_v24 = vadd.f32 %v812_v23, %v811_v20 }
 0xce0   : > { %v814_v25 = vrot.slane %v813_v24, 1 }
 0xce2   : > { %v815_v32 = vadd.f32 %v814_v25, %v813_v24 }
 0xce4   : > { %vm816_vm12 = vcmp.ge.f32.partialorder %v815_v32, %v1961_v59 }
 0xce5   : > { %v817_v39 = vsel %vm816_vm12, %v804_v14, %v803_v13 }
 0xce6   : > { %v818_v26 = vor.u32 1, %v817_v39 }
 0xce8   : > { %vm819_vm13 = vcmp.ge.s32.totalorder %v1953_v49, %v818_v26 }
 0xce9   : > { %v820_v40 = vsel %vm819_vm13, 1.0, %v1512_v43 }
 0xcea   : > { %v821_v30 = vsel %vm342_vm0, %v820_v40, 0.0 }
 0xceb   : > { %822 = vadd.xlane.f32.xlu0 %v821_v30 }
 0xd78   : > { %v823_v44 = vpop.xlane.xlu0 %822 }
 0xd79   : > { %v824_v48 = vrot.slane %v823_v44, 4 }
 0xd7b   : > { %v825_v31 = vadd.f32 %v824_v48, %v823_v44 }
 0xd7d   : > { %v826_v33 = vrot.slane %v825_v31, 2 }
 0xd7f   : > { %v827_v60 = vadd.f32 %v826_v33, %v825_v31 }
 0xd81   : > { %v828_v50 = vrot.slane %v827_v60, 1 }
 0xd83   : > { %v829_v51 = vadd.f32 %v828_v50, %v827_v60 }
 0xd85   : > { %vm830_vm14 = vcmp.ge.f32.partialorder %v829_v51, %v1961_v59 }
 0xd86   : > { %v2042_v35 = vsel %vm830_vm14, %v818_v26, %v817_v39 }
 0xd87   : > { %vm832_vm15 = vcmp.gt.s32.totalorder %v1953_v49, %v2042_v35  ;;  %vm833_vm2 = vcmp.eq.s32.totalorder %v1953_v49, %v2042_v35 }
 0xd88   : > { %v834_v34 = vsel %vm832_vm15, 1.0, %v1512_v43  ;;  %vm2054_vm3 = vmand %vm833_vm2, %vm338_vm9 }
 0xd89   : > { %v835_v54 = vsel %vm342_vm0, %v834_v34, 0.0  ;;  %v2061_v36 = vsel %vm2054_vm3, %v846_v52, 0 }
 0xd8a   : > { %836 = vadd.xlane.f32.xlu1 %v835_v54  ;;  %vm848_vm4 = vcmp.ge.s32.totalorder %v2061_v36, 256 }
 0xd8b   : > { %v849_v56 = vsel %vm848_vm4, 1.0, %v1512_v43 }
 0xd8c   : > { %v850_v57 = vsel %vm342_vm0, %v849_v56, 0.0 }
 0xd8d   : > { %851 = vadd.xlane.f32.xlu0 %v850_v57 }
 0xe17   : > { %v837_v58 = vpop.xlane.xlu1 %836 }
 0xe18   : > { %v838_v37 = vrot.slane %v837_v58, 4 }
 0xe1a   : > { %v839_v61 = vadd.f32 %v838_v37, %v837_v58  ;;  %v852_v38 = vpop.xlane.xlu0 %851 }
 0xe1b   : > { %v853_v63 = vrot.slane %v852_v38, 4 }
 0xe1c   : > { %v840_v0 = vrot.slane %v839_v61, 2 }
 0xe1d   : > { %v854_v1 = vadd.f32 %v853_v63, %v852_v38 }
 0xe1e   : > { %v841_v41 = vadd.f32 %v840_v0, %v839_v61 }
 0xe1f   : > { %v855_v2 = vrot.slane %v854_v1, 2 }
 0xe20   : > { %v842_v3 = vrot.slane %v841_v41, 1 }
 0xe21   : > { %v856_v4 = vadd.f32 %v855_v2, %v854_v1 }
 0xe22   : > { %v843_v42 = vadd.f32 %v842_v3, %v841_v41 }
 0xe23   : > { %v857_v7 = vrot.slane %v856_v4, 1 }
 0xe24   : > { %v2067_v8 = vsub.f32 %v1961_v59, %v843_v42 }
 0xe25   : > { %v858_v9 = vadd.f32 %v857_v7, %v856_v4 }
 0xe27   : > { %vm859_vm5 = vcmp.ge.f32.partialorder %v858_v9, %v2067_v8 }
 0xe28   : > { %v860_v5 = vsel %vm859_vm5, 256, %v1514_v62 }
 0xe29   : > { %v861_v45 = vor.u32 128, %v860_v5 }
 0xe2b   : > { %vm862_vm6 = vcmp.ge.s32.totalorder %v2061_v36, %v861_v45 }
 0xe2c   : > { %v863_v6 = vsel %vm862_vm6, 1.0, %v1512_v43 }
 0xe2d   : > { %v864_v10 = vsel %vm342_vm0, %v863_v6, 0.0 }
 0xe2e   : > { %865 = vadd.xlane.f32.xlu1 %v864_v10 }
 0xebb   : > { %v866_v15 = vpop.xlane.xlu1 %865 }
 0xebc   : > { %v867_v16 = vrot.slane %v866_v15, 4 }
 0xebe   : > { %v868_v46 = vadd.f32 %v867_v16, %v866_v15 }
 0xec0   : > { %v869_v11 = vrot.slane %v868_v46, 2 }
 0xec2   : > { %v870_v12 = vadd.f32 %v869_v11, %v868_v46 }
 0xec4   : > { %v871_v59 = vrot.slane %v870_v12, 1 }
 0xec6   : > { %v872_v21 = vadd.f32 %v871_v59, %v870_v12 }
 0xec8   : > { %vm873_vm7 = vcmp.ge.f32.partialorder %v872_v21, %v2067_v8 }
 0xec9   : > { %v874_v13 = vsel %vm873_vm7, %v861_v45, %v860_v5 }
 0xeca   : > { %v875_v14 = vor.u32 64, %v874_v13 }
 0xecc   : > { %vm876_vm8 = vcmp.ge.s32.totalorder %v2061_v36, %v875_v14 }
 0xecd   : > { %v877_v62 = vsel %vm876_vm8, 1.0, %v1512_v43 }
 0xece   : > { %v878_v47 = vsel %vm342_vm0, %v877_v62, 0.0 }
 0xecf   : > { %879 = vadd.xlane.f32.xlu0 %v878_v47 }
 0xf5c   : > { %v880_v22 = vpop.xlane.xlu0 %879 }
 0xf5d   : > { %v881_v18 = vrot.slane %v880_v22, 4 }
 0xf5f   : > { %v882_v19 = vadd.f32 %v881_v18, %v880_v22 }
 0xf61   : > { %v883_v20 = vrot.slane %v882_v19, 2 }
 0xf63   : > { %v884_v23 = vadd.f32 %v883_v20, %v882_v19 }
 0xf65   : > { %v885_v24 = vrot.slane %v884_v23, 1 }
 0xf67   : > { %v886_v25 = vadd.f32 %v885_v24, %v884_v23 }
 0xf69   : > { %vm887_vm10 = vcmp.ge.f32.partialorder %v886_v25, %v2067_v8 }
 0xf6a   : > { %v888_v32 = vsel %vm887_vm10, %v875_v14, %v874_v13 }
 0xf6b   : > { %v889_v39 = vor.u32 32, %v888_v32 }
 0xf6d   : > { %vm890_vm11 = vcmp.ge.s32.totalorder %v2061_v36, %v889_v39 }
 0xf6e   : > { %v891_v26 = vsel %vm890_vm11, 1.0, %v1512_v43 }
 0xf6f   : > { %v892_v40 = vsel %vm342_vm0, %v891_v26, 0.0 }
 0xf70   : > { %893 = vadd.xlane.f32.xlu1 %v892_v40 }
 0xffd   : > { %v894_v30 = vpop.xlane.xlu1 %893 }
 0xffe   : > { %v895_v44 = vrot.slane %v894_v30, 4 }
0x1000   : > { %v896_v48 = vadd.f32 %v895_v44, %v894_v30 }
0x1002   : > { %v897_v31 = vrot.slane %v896_v48, 2 }
0x1004   : > { %v898_v33 = vadd.f32 %v897_v31, %v896_v48  ;;  %v989_v48 = vld [vmem:[%s1738_s28] sm:$0x1]  ;;  %v990_v31 = vld [vmem:[%s1738_s28 + $0x1] sm:$0x1] }
0x1006   : > { %v899_v60 = vrot.slane %v898_v33, 1 }
0x1008   : > { %v900_v50 = vadd.f32 %v899_v60, %v898_v33  ;;  %v997_v33 = vld [vmem:[%s1745_s10] sm:$0x1]  ;;  %v993_v60 = vunpack.c.l.bf16 %v989_v48 }
0x100a   : > { %vm901_vm12 = vcmp.ge.f32.partialorder %v900_v50, %v2067_v8  ;;  %v994_v50 = vunpack.c.l.bf16 %v990_v31 }
0x100b   : > { %v902_v51 = vsel %vm901_vm12, %v889_v39, %v888_v32 }
0x100c   : > { %v903_v52 = vor.u32 16, %v902_v51 }
0x100e   : > { %vm904_vm13 = vcmp.ge.s32.totalorder %v2061_v36, %v903_v52 }
0x100f   : > { %v905_v34 = vsel %vm904_vm13, 1.0, %v1512_v43 }
0x1010   : > { %v906_v54 = vsel %vm342_vm0, %v905_v34, 0.0  ;;  %v991_v34 = vld [vmem:[%s1738_s28 + $0x2] sm:$0x1] }
0x1011   : > { %907 = vadd.xlane.f32.xlu0 %v906_v54  ;;  %v999_v54 = vld [vmem:[%s1745_s10 + $0x2] sm:$0x1] }
0x109e   : > { %v908_v56 = vpop.xlane.xlu0 %907 }
0x109f   : > { %v909_v57 = vrot.slane %v908_v56, 4 }
0x10a1   : > { %v910_v58 = vadd.f32 %v909_v57, %v908_v56  ;;  %v995_v57 = vunpack.c.l.bf16 %v991_v34 }
0x10a3   : > { %v911_v37 = vrot.slane %v910_v58, 2 }
0x10a5   : > { %v912_v61 = vadd.f32 %v911_v37, %v910_v58  ;;  %v1003_v58 = vunpack.c.l.bf16 %v999_v54 }
0x10a7   : > { %v913_v38 = vrot.slane %v912_v61, 1 }
0x10a9   : > { %v914_v63 = vadd.f32 %v913_v38, %v912_v61  ;;  %v992_v61 = vld [vmem:[%s1738_s28 + $0x3] sm:$0x1] }
0x10ab   : > { %vm915_vm14 = vcmp.ge.f32.partialorder %v914_v63, %v2067_v8  ;;  %v996_v63 = vunpack.c.l.bf16 %v992_v61 }
0x10ac   : > { %v916_v0 = vsel %vm915_vm14, %v903_v52, %v902_v51  ;;  %v998_v51 = vld [vmem:[%s1745_s10 + $0x1] sm:$0x1]  ;;  %v1001_v52 = vunpack.c.l.bf16 %v997_v33 }
0x10ad   : > { %v917_v1 = vor.u32 8, %v916_v0  ;;  %v1002_v56 = vunpack.c.l.bf16 %v998_v51 }
0x10ae   : > { %v1005_v37 = vsub.f32 %v993_v60, %v1001_v52 }
0x10af   : > { %vm918_vm2 = vcmp.ge.s32.totalorder %v2061_v36, %v917_v1  ;;  %v1006_v38 = vsub.f32 %v994_v50, %v1002_v56 }
0x10b0   : > { %v919_v41 = vsel %vm918_vm2, 1.0, %v1512_v43 }
0x10b1   : > { %v920_v2 = vsel %vm342_vm0, %v919_v41, 0.0  ;;  %v1009_v41 = vand.u32 2147483647, %v1005_v37 }
0x10b2   : > { %921 = vadd.xlane.f32.xlu1 %v920_v2  ;;  %v1010_v2 = vand.u32 2147483647, %v1006_v38 }
0x10b3   : > { %vm1013_vm11 = vcmp.lt.f32.partialorder %v1009_v41, 1.0 }
0x10b4   : > { %vm1014_vm12 = vcmp.lt.f32.partialorder %v1010_v2, 1.0 }
0x113f   : > { %v922_v3 = vpop.xlane.xlu1 %921 }
0x1140   : > { %v923_v4 = vrot.slane %v922_v3, 4 }
0x1142   : > { %v924_v42 = vadd.f32 %v923_v4, %v922_v3 }
0x1144   : > { %v925_v7 = vrot.slane %v924_v42, 2 }
0x1146   : > { %v926_v9 = vadd.f32 %v925_v7, %v924_v42  ;;  %v1017_v42 = vmul.f32 0.5, %v1009_v41  ;;  %v1018_v7 = vmul.f32 0.5, %v1010_v2 }
0x1148   : > { %v927_v5 = vrot.slane %v926_v9, 1 }
0x114a   : > { %v928_v45 = vadd.f32 %v927_v5, %v926_v9 }
0x114c   : > { %vm929_vm4 = vcmp.ge.f32.partialorder %v928_v45, %v2067_v8  ;;  %v1021_v45 = vmul.f32 %v1017_v42, %v1009_v41 }
0x114d   : > { %v930_v6 = vsel %vm929_vm4, %v917_v1, %v916_v0  ;;  %v1007_v1 = vsub.f32 %v995_v57, %v1003_v58 }
0x114e   : > { %v931_v10 = vor.u32 4, %v930_v6 }
0x114f   : > { %v1011_v4 = vand.u32 2147483647, %v1007_v1 }
0x1150   : > { %vm932_vm5 = vcmp.ge.s32.totalorder %v2061_v36, %v931_v10 }
0x1151   : > { %v933_v15 = vsel %vm932_vm5, 1.0, %v1512_v43  ;;  %v1019_v5 = vmul.f32 0.5, %v1011_v4  ;;  %vm1015_vm13 = vcmp.lt.f32.partialorder %v1011_v4, 1.0 }
0x1152   : > { %v934_v16 = vsel %vm342_vm0, %v933_v15, 0.0  ;;  %v1222_v15 = vadd.f32 -0.5, %v1010_v2 }
0x1153   : > { %935 = vadd.xlane.f32.xlu0 %v934_v16 }
0x11e0   : > { %v936_v46 = vpop.xlane.xlu0 %935 }
0x11e1   : > { %v937_v11 = vrot.slane %v936_v46, 4 }
0x11e3   : > { %v938_v12 = vadd.f32 %v937_v11, %v936_v46  ;;  %v1023_v46 = vmul.f32 %v1019_v5, %v1011_v4  ;;  %v1223_v11 = vadd.f32 -0.5, %v1011_v4 }
0x11e5   : > { %v939_v59 = vrot.slane %v938_v12, 2 }
0x11e7   : > { %v940_v21 = vadd.f32 %v939_v59, %v938_v12 }
0x11e9   : > { %v941_v13 = vrot.slane %v940_v21, 1 }
0x11eb   : > { %v942_v14 = vadd.f32 %v941_v13, %v940_v21 }
0x11ed   : > { %vm943_vm6 = vcmp.ge.f32.partialorder %v942_v14, %v2067_v8 }
0x11ee   : > { %v944_v62 = vsel %vm943_vm6, %v931_v10, %v930_v6  ;;  %v1221_v6 = vadd.f32 -0.5, %v1009_v41  ;;  %v1022_v10 = vmul.f32 %v1018_v7, %v1010_v2 }
0x11ef   : > { %v945_v47 = vor.u32 2, %v944_v62 }
0x11f0   : > { %v1029_v12 = vsel %vm1013_vm11, %v1021_v45, %v1221_v6  ;;  %v1030_v59 = vsel %vm1014_vm12, %v1022_v10, %v1222_v15 }
0x11f1   : > { %vm946_vm7 = vcmp.ge.s32.totalorder %v2061_v36, %v945_v47  ;;  %v1034_v21 = vsel %vm339_vm1, %v1029_v12, 0.0 }
0x11f2   : > { %v947_v22 = vsel %vm946_vm7, 1.0, %v1512_v43 }
0x11f3   : > { %v948_v18 = vsel %vm342_vm0, %v947_v22, 0.0 }
0x11f4   : > { %949 = vadd.xlane.f32.xlu1 %v948_v18  ;;  %v1038_v18 = vsel %vm342_vm0, %v1034_v21, 0.0 }
0x1281   : > { %v950_v19 = vpop.xlane.xlu1 %949 }
0x1282   : > { %v951_v20 = vrot.slane %v950_v19, 4 }
0x1284   : > { %v952_v23 = vadd.f32 %v951_v20, %v950_v19 }
0x1286   : > { %v953_v24 = vrot.slane %v952_v23, 2 }
0x1288   : > { %v954_v25 = vadd.f32 %v953_v24, %v952_v23 }
0x128a   : > { %v955_v32 = vrot.slane %v954_v25, 1 }
0x128c   : > { %v956_v39 = vadd.f32 %v955_v32, %v954_v25 }
0x128e   : > { %vm957_vm8 = vcmp.ge.f32.partialorder %v956_v39, %v2067_v8 }
0x128f   : > { %v2099_v26 = vsel %vm957_vm8, %v945_v47, %v944_v62  ;;  %v1031_v62 = vsel %vm1015_vm13, %v1023_v46, %v1223_v11  ;;  %v1035_v47 = vsel %vm339_vm1, %v1030_v59, 0.0 }
0x1290   : > { %v959_v40 = vor.u32 1, %v2099_v26  ;;  %v1036_v22 = vsel %vm339_vm1, %v1031_v62, 0.0  ;;  %v1039_v19 = vsel %vm342_vm0, %v1035_v47, 0.0 }
0x1291   : > { %v1040_v23 = vadd.f32 %v1039_v19, %v1038_v18  ;;  %v1041_v24 = vsel %vm342_vm0, %v1036_v22, 0.0 }
0x1292   : > { %vm960_vm10 = vcmp.ge.s32.totalorder %v2061_v36, %v959_v40 }
0x1293   : > { %v961_v30 = vsel %vm960_vm10, 1.0, %v1512_v43  ;;  %v1000_v43 = vld [vmem:[%s1745_s10 + $0x3] sm:$0x1]  ;;  %v1042_v32 = vadd.f32 %v1041_v24, %v1040_v23  ;;  %s1435_s10 = scalar_lea.vmem %s2154_s6, 128 }
0x1294   : > { %v962_v44 = vsel %vm342_vm0, %v961_v30, 0.0  ;;  %v1004_v0 = vunpack.c.l.bf16 %v1000_v43  ;;  %p1436_p7 = scmp.ne.s32.totalorder %s2154_s6, %s1435_s10  ;;  %p1443_p8 = scmp.lt.s32.totalorder %s1441_s30, %s1435_s10 }
0x1295   : > { %963 = vadd.xlane.f32.xlu0 %v962_v44 }
0x1296   : > { %v1008_v3 = vsub.f32 %v996_v63, %v1004_v0  ;;  %p1437_p9 = pnand %p1436_p7, %p2224_p6  ;;  %p1444_p10 = por %p1443_p8, %p1442_p0 }
0x1298   : > { %v1012_v9 = vand.u32 2147483647, %v1008_v3  ;;  %p1438_p12 = pneg %p1437_p9 }
0x129a   : > { %v1020_v16 = vmul.f32 0.5, %v1012_v9  ;;  %v1224_v14 = vadd.f32 -0.5, %v1012_v9  ;;  %vm1016_vm14 = vcmp.lt.f32.partialorder %v1012_v9, 1.0  ;;  %p1445_p11 = pnand %p1444_p10, %p1438_p12 }
0x129c   : > { %v1024_v13 = vmul.f32 %v1020_v16, %v1012_v9 }
0x129e   : > { %v1032_v20 = vsel %vm1016_vm14, %v1024_v13, %v1224_v14 }
0x129f   : > { %v1037_v25 = vsel %vm339_vm1, %v1032_v20, 0.0 }
0x12a0   : > { %v1043_v39 = vsel %vm342_vm0, %v1037_v25, 0.0 }
0x12a1   : > { %v1044_v30 = vadd.f32 %v1043_v39, %v1042_v32 }
0x12a3   : > { %1045 = vadd.xlane.f32.xlu0 %v1044_v30 }
0x1322   : > { %v964_v44 = vpop.xlane.xlu0 %963 }
0x1323   : > { %v965_v48 = vrot.slane %v964_v44, 4 }
0x1325   : > { %v966_v31 = vadd.f32 %v965_v48, %v964_v44 }
0x1327   : > { %v967_v33 = vrot.slane %v966_v31, 2 }
0x1329   : > { %v968_v60 = vadd.f32 %v967_v33, %v966_v31 }
0x132b   : > { %v969_v50 = vrot.slane %v968_v60, 1 }
0x132d   : > { %v970_v51 = vadd.f32 %v969_v50, %v968_v60 }
0x132f   : > { %vm971_vm2 = vcmp.ge.f32.partialorder %v970_v51, %v2067_v8 }
0x1330   : > { %v972_v52 = vsel %vm971_vm2, %v959_v40, %v2099_v26  ;;  %v1046_v26 = vpop.xlane.xlu0 %1045 }
0x1331   : > { %vm973_vm4 = vcmp.ge.s32.totalorder %v2061_v36, %v972_v52  ;;  %v1047_v36 = vrot.slane %v1046_v26, 4 }
0x1332   : > { %vm974_vm5 = vmand %vm2054_vm3, %vm973_vm4 }
0x1333   : > { %vm975_vm6 = vmor %vm832_vm15, %vm974_vm5  ;;  %v1048_v53 = vadd.f32 %v1047_v36, %v1046_v26 }
0x1334   : > { %vm976_vm7 = vmor %vm339_vm1, %vm975_vm6  ;;  %vm1057_vm1 = vcmp.eq.s32.totalorder %v1938_v28, 1 }
0x1335   : > { %vm977_vm8 = vmand %vm976_vm7, %vm338_vm9  ;;  %v1049_v40 = vrot.slane %v1048_v53, 2  ;;  %vm1056_vm9 = vcmp.eq.s32.totalorder %v1938_v28, 0 }
0x1336   : > { %v978_v8 = vsel %vm977_vm8, %v1950_v27, 0.0 }
0x1337   : > { %v979_v34 = vsel %vm342_vm0, %v978_v8, 0.0  ;;  %v1050_v35 = vadd.f32 %v1049_v40, %v1048_v53  ;;  %vm1058_vm0 = vcmp.eq.s32.totalorder %v1938_v28, 2 }
0x1338   : > { %980 = vadd.xlane.f32.xlu1 %v979_v34 }
0x1339   : > { %v1051_v58 = vrot.slane %v1050_v35, 1 }
0x133b   : > { %v1052_v61 = vadd.f32 %v1051_v58, %v1050_v35 }
0x13c5   : > { %v981_v54 = vpop.xlane.xlu1 %980 }
0x13c6   : > { %v982_v56 = vrot.slane %v981_v54, 4 }
0x13c8   : > { %v983_v49 = vadd.f32 %v982_v56, %v981_v54 }
0x13ca   : > { %v984_v17 = vrot.slane %v983_v49, 2 }
0x13cc   : > { %v985_v57 = vadd.f32 %v984_v17, %v983_v49 }
0x13ce   : > { %v986_v29 = vrot.slane %v985_v57, 1 }
0x13d0   : > { %v987_v37 = vadd.f32 %v986_v29, %v985_v57 }
0x13d2   : > { %1234 = vpush %v987_v37 }
0x13d3   : > { %1236 = vpush %v1052_v61 }
0x13d4   : > { %1238 = vpush %v1958_v55 }
0x1403   : > { %s1235_s7 = spop %1234 }
0x1404   : > { %s1237_s8 = spop %1236  ;;  %v1061_v27 = vstv %s1235_s7 }
0x1405   : > { %s1239_s29 = spop %1238  ;;  %v1063_v63 = vstv %s1237_s8 }
0x1406   : > { %v1059_v43 = vstv %s1239_s29 }
0x1407   : > { %v1060_v38 = vsel %vm1058_vm0, %v1059_v43, 0.0 }
0x1408   : > { %v1062_v55 = vsel %vm1057_vm1, %v1061_v27, %v1060_v38 }
0x1409   : > { %v1064_v0 = vsel %vm1056_vm9, %v1063_v63, %v1062_v55 }
0x140a   : > { %1065 = vst [vmem:[%s305_s14] sm:$0xff] %v1064_v0 }
0x140b   : > { %1448 = shalt.err (!%p1445_p11)
}
0x140c   : > { %s1449_s0 = scalar_lea.hbm %s2152_s12, 128  ;;  %s1453_s22 = scalar_lea.hbm %s2200_s4, 256 }
0x140d   : > { %p1450_p4 = scmp.ne.s32.totalorder %s2152_s12, %s1449_s0  ;;  %p1454_p2 = scmp.lt.u32.totalorder %s2152_s12, %s2200_s4 }
0x140e   : > { %p1455_p1 = scmp.lt.u32.totalorder %s1453_s22, %s1449_s0  ;;  %p1457_p7 = scmp.lt.u32.totalorder %s1449_s0, %s2152_s12 }
0x140f   : > { %p1451_p3 = pnand %p1450_p4, %p2224_p6 }
0x1410   : > { %p1456_p13 = por %p1455_p1, %p1454_p2 }
0x1411   : > { %p1452_p5 = pneg %p1451_p3 }
0x1412   : > { %p1458_p9 = por %p1457_p7, %p1456_p13 }
0x1414   : > { %p1459_p12 = pnand %p1458_p9, %p1452_p5 }
0x1416   : > { %1462 = shalt.err (!%p1459_p12)
}
0x1417   : > { %1246 = dma.vmem_to_hbm [thread:$0]  (%p2224_p6), %s2154_s6, 128, %s2152_s12, %s1067_s19  }
0x1418 PF: > { %s1092_s7 = sand.u32 1, %s1493_s15   ;;  %p2225_p0 = scmp.ne.s32.totalorder %s2211_s27, 0 }
0x1419   : > { %p2226_p8 = scmp.ge.s32.totalorder %s1505_s18, 2  ;;  %s1093_s8 = scalar_lea.sflag [#allocation4], %s1092_s7 }
0x141b   : > { %p1259_p10 = pnand %p2226_p8, %p2225_p0 }
0x141d   : > { %1488 = dma.done.wait (!%p1259_p10), %s1093_s8, 128  }
0x141e   : > { %1490 = vsyncadd (!%p1259_p10), %s1093_s8, 4294967168  ;;  %p20_p11 = scmp.ge.s32.totalorder %s1566_s21, 4   ;;  %s2227_s15 = smov %s1497_s16 }
0x141f   : > { %s2228_s16 = smov %s1501_s17  ;;  %s2229_s17 = smov %s1578_s24 }
0x1420   : > { %s2230_s18 = smov %s1566_s21  ;;  %22 = sbr.rel (!%p20_p11) target bundleno = 10 (0xa), region = 108 }
0x1427   :  { %1098 = vsyncpa [#allocation3], 1 }
0x1428   :  { %1100 = vsyncpa [#allocation3 + $0x1], 1 }
0x1429   :  { %1101 = vsyncpa [#allocation6], 1 }
0x142a   :  { %1103 = vsyncpa [#allocation6 + $0x1], 1 }
0x142b   :  { %1104 = vsyncpa [#allocation4], 1 }
0x142c   :  { %1106 = vsyncpa [#allocation4 + $0x1], 1 }

</bundles_post_ra>
